<compile_context>
chip_gen: v6e
topology: v6e:2x2x1
jax: 0.10.0
libtpu: 0.0.40
codegen_flags: <defaults>
</compile_context>

<pallas_src>
import jax
import jax.numpy as jnp
import numpy as np
from jax.experimental import pallas as pl
from jax.experimental.pallas import tpu as pltpu

# Small, module-consistent shapes
B_BLK = 8    # sequences per grid step (fills the 8 sublanes)
T = 8        # sequence length
H = 32       # hidden_size
V = 64       # output_size (vocab)


def decoder_kernel(tok_ref, h0_ref, emb_ref,
                   win_ref, bin_ref, whh_ref, bhn_ref,
                   wout_ref, bout_ref,
                   logp_ref, hout_ref):
    """One group of B_BLK sequences: embedding (one-hot matmul) + ReLU,
    bidirectional GRU (block-diagonal fwd/bwd recurrence), Linear, LogSoftmax."""
    bblk = h0_ref.shape[0]
    tb = tok_ref.shape[1]           # T * B_BLK (time-major rows within the group)
    t = tb // bblk
    h = whh_ref.shape[0] // 2
    v = emb_ref.shape[0]
    bf16 = jnp.bfloat16

    # ---- hoisted: embedding gather as one-hot matmul, ReLU fused -----------------
    tok = tok_ref[0]                                                    # (T*B, 1) int32
    iota_v = jax.lax.broadcasted_iota(jnp.int32, (tb, v), 1)
    onehot = (iota_v == tok).astype(jnp.float32).astype(bf16)           # (T*B, V)
    x = jnp.maximum(
        jnp.dot(onehot, emb_ref[...], preferred_element_type=jnp.float32), 0.0)   # (T*B, H) f32

    # ---- hoisted: ONE fused input projection for ALL steps, both directions ------
    # win lane layout: [ fwd: r_f r_b z_f z_b n_f n_b | bwd: r_f r_b z_f z_b n_f n_b ]
    gi_all = jnp.dot(x.astype(bf16), win_ref[...],
                     preferred_element_type=jnp.float32)                # (T*B, 12H)
    gif = gi_all[:, :6 * h] + bin_ref[...]     # contains bih (all gates) + bhh_r/bhh_z folded
    gib = gi_all[:, 6 * h:]

    whh = whh_ref[...]                          # (2H, 6H) bf16, block-diag fwd/bwd
    bhn = bhn_ref[...]                          # (1, 2H) f32 = [bhh_n_f | bhh_n_b]

    # ---- serial recurrence: one bf16 MXU matmul per step, fully unrolled ---------
    h_cat = h0_ref[...]                         # (B, 2H) f32 = [h_f | h_b]
    h_cat_s0 = h_cat
    for s in range(t):
        # fwd consumes time s, bwd consumes time t-1-s — static, sublane-aligned slices.
        gi = gif[s * bblk:(s + 1) * bblk, :] + gib[(t - 1 - s) * bblk:(t - s) * bblk, :]
        gh = jnp.dot(h_cat.astype(bf16), whh, preferred_element_type=jnp.float32)   # (B, 6H)
        rz = jax.nn.sigmoid(gi[:, :4 * h] + gh[:, :4 * h])             # (B, 4H) = [r_f r_b z_f z_b]
        r = rz[:, :2 * h]
        z = rz[:, 2 * h:]
        n = jnp.tanh(gi[:, 4 * h:] + r * (gh[:, 4 * h:] + bhn))        # (B, 2H)
        h_cat = (1.0 - z) * n + z * h_cat
        if s == 0:
            h_cat_s0 = h_cat        # backward hidden aligned with time step T-1

    # ---- output[:, -1, :] = [h_f(T-1) | h_b(T-1)] -> Linear -> LogSoftmax --------
    lane = jax.lax.broadcasted_iota(jnp.int32, (bblk, 2 * h), 1)
    last = jnp.where(lane < h, h_cat, h_cat_s0)                        # (B, 2H)
    # wout is padded to 128 lanes; padded bias columns are -1e30 so they contribute 0 to lse.
    logits = jnp.dot(last.astype(bf16), wout_ref[...],
                     preferred_element_type=jnp.float32) + bout_ref[...]            # (B, VP)
    m = jnp.max(logits, axis=-1, keepdims=True)
    lse = jnp.log(jnp.sum(jnp.exp(logits - m), axis=-1, keepdims=True)) + m
    logp_ref[...] = logits - lse

    # final hidden of both directions as ONE lane-dense slab (split in the wrapper)
    hout_ref[...] = h_cat


def init_params(key, hidden_size, output_size):
    """Deterministic synthetic parameters (shapes match the torch module)."""
    ks = jax.random.split(key, 12)
    bound = 1.0 / np.sqrt(hidden_size)
    u = lambda k, shape: jax.random.uniform(k, shape, jnp.float32, -bound, bound)
    return dict(
        embedding=u(ks[0], (output_size, hidden_size)),        # nn.Embedding(V, H)
        w_ih_f=u(ks[1], (3 * hidden_size, hidden_size)),       # gru.weight_ih_l0
        w_hh_f=u(ks[2], (3 * hidden_size, hidden_size)),       # gru.weight_hh_l0
        b_ih_f=u(ks[3], (3 * hidden_size,)),
        b_hh_f=u(ks[4], (3 * hidden_size,)),
        w_ih_b=u(ks[5], (3 * hidden_size, hidden_size)),       # gru.weight_ih_l0_reverse
        w_hh_b=u(ks[6], (3 * hidden_size, hidden_size)),
        b_ih_b=u(ks[7], (3 * hidden_size,)),
        b_hh_b=u(ks[8], (3 * hidden_size,)),
        w_out=u(ks[9], (output_size, 2 * hidden_size)),        # nn.Linear(2H, V)
        b_out=u(ks[10], (output_size,)),
    )


def prepare_params(params):
    """One-time weight plumbing (outside the hot path): transpose, block-diagonalize fwd/bwd,
    fuse fwd/bwd input projections, fold biases, pad the output head to 128 lanes, cast
    matmul weights to bf16.  6H lane layout everywhere: [r_f r_b | z_f z_b | n_f n_b]."""
    h = params["embedding"].shape[1]
    v = params["embedding"].shape[0]
    vp = max(128, ((v + 127) // 128) * 128)     # lane-dense padded vocab
    f32, bf16 = jnp.float32, jnp.bfloat16
    zblk = jnp.zeros((h, h), f32)

    def g(w, i):  # torch (3H, H), gate order (r,z,n) -> transposed (H, H) block of gate i
        return w[i * h:(i + 1) * h, :].T.astype(f32)

    wif, wib = params["w_ih_f"], params["w_ih_b"]
    whf, whb = params["w_hh_f"], params["w_hh_b"]

    # Fused input projection: fwd lanes [0:6H], bwd lanes [6H:12H].
    win_f = jnp.concatenate([g(wif, 0), zblk, g(wif, 1), zblk, g(wif, 2), zblk], axis=1)  # (H, 6H)
    win_b = jnp.concatenate([zblk, g(wib, 0), zblk, g(wib, 1), zblk, g(wib, 2)], axis=1)  # (H, 6H)
    win_cat = jnp.concatenate([win_f, win_b], axis=1).astype(bf16)                        # (H, 12H)

    # Hidden recurrence: block-diagonal over direction, one matmul per step.
    whh = jnp.concatenate([
        jnp.concatenate([g(whf, 0), zblk, g(whf, 1), zblk, g(whf, 2), zblk], axis=1),  # rows <- h_f
        jnp.concatenate([zblk, g(whb, 0), zblk, g(whb, 1), zblk, g(whb, 2)], axis=1),  # rows <- h_b
    ], axis=0).astype(bf16)                                                            # (2H, 6H)

    bih_f, bhh_f = params["b_ih_f"].astype(f32), params["b_hh_f"].astype(f32)
    bih_b, bhh_b = params["b_ih_b"].astype(f32), params["b_hh_b"].astype(f32)
    # Fold bih (all gates) plus bhh_r / bhh_z into the hoisted projection bias;
    # keep bhh_n separate (torch: n = tanh(gi_n + bih_n + r * (gh_n + bhh_n))).
    b_in = jnp.concatenate([
        bih_f[0:h] + bhh_f[0:h],           bih_b[0:h] + bhh_b[0:h],            # r
        bih_f[h:2 * h] + bhh_f[h:2 * h],   bih_b[h:2 * h] + bhh_b[h:2 * h],    # z
        bih_f[2 * h:],                     bih_b[2 * h:],                      # n (input-side only)
    ])[None, :]                                                                # (1, 6H) f32
    bhn = jnp.concatenate([bhh_f[2 * h:], bhh_b[2 * h:]])[None, :]             # (1, 2H) f32

    wout = params["w_out"].T.astype(f32)                                       # (2H, V)
    wout_pad = jnp.zeros((2 * h, vp), f32).at[:, :v].set(wout).astype(bf16)    # (2H, VP)
    bout_pad = jnp.full((1, vp), -1e30, f32).at[0, :v].set(params["b_out"].astype(f32))

    return dict(
        emb=params["embedding"].astype(bf16),
        win=win_cat, b_in=b_in, whh=whh, bhn=bhn,
        wout=wout_pad, bout=bout_pad,
    )


@jax.jit
def decoder_rnn_forward(token_ids, hidden, prep):
    n, tlen = token_ids.shape
    h = prep["bhn"].shape[1] // 2
    v = prep["emb"].shape[0]
    vp = prep["wout"].shape[1]
    assert n % B_BLK == 0, "batch must be a multiple of B_BLK"
    g = n // B_BLK
    tb = tlen * B_BLK

    # Time-major token ids within each group of B_BLK sequences: (G, T*B_BLK, 1).
    tok_tm = jnp.transpose(token_ids.reshape(g, B_BLK, tlen).astype(jnp.int32),
                           (0, 2, 1)).reshape(g, tb, 1)
    # Hidden packed as one lane-dense slab per sequence: (N, 2H) = [h_f | h_b].
    h0_cat = jnp.concatenate([hidden[0], hidden[1]], axis=-1)

    def resident(shape):   # weight stays VMEM-resident across the whole grid
        return pl.BlockSpec(shape, lambda i: (0,) * len(shape))

    in_specs = [
        pl.BlockSpec((1, tb, 1), lambda i: (i, 0, 0)),      # token ids (per group)
        pl.BlockSpec((B_BLK, 2 * h), lambda i: (i, 0)),     # h0 (per group)
        resident(prep["emb"].shape),
        resident(prep["win"].shape),
        resident(prep["b_in"].shape),
        resident(prep["whh"].shape),
        resident(prep["bhn"].shape),
        resident(prep["wout"].shape),
        resident(prep["bout"].shape),
    ]
    out_specs = (
        pl.BlockSpec((B_BLK, vp), lambda i: (i, 0)),        # padded log-probs
        pl.BlockSpec((B_BLK, 2 * h), lambda i: (i, 0)),     # final hidden slab
    )
    out_shape = (
        jax.ShapeDtypeStruct((n, vp), jnp.float32),
        jax.ShapeDtypeStruct((n, 2 * h), jnp.float32),
    )

    logp_pad, hcat_out = pl.pallas_call(
        decoder_kernel,
        out_shape=out_shape,
        grid=(g,),
        in_specs=in_specs,
        out_specs=out_specs,
        compiler_params=pltpu.CompilerParams(dimension_semantics=("parallel",)),
    )(tok_tm, h0_cat, prep["emb"], prep["win"], prep["b_in"],
      prep["whh"], prep["bhn"], prep["wout"], prep["bout"])

    logp = logp_pad[:, :v]
    hidden_out = jnp.stack([hcat_out[:, :h], hcat_out[:, h:]], axis=0)
    return logp, hidden_out


def _reference_forward(token_ids, hidden, params, wdtype):
    """Pure-JAX reference of the same math.  With wdtype=bfloat16 it mirrors the kernel's
    bf16-weight / f32-accumulation arithmetic; with float32 it is the exact module math."""
    f32 = jnp.float32
    q = lambda w: w.astype(wdtype)
    h = params["embedding"].shape[1]
    emb_q = q(params["embedding"]).astype(f32)
    x = jnp.maximum(jnp.take(emb_q, token_ids, axis=0), 0.0)          # (N, T, H)

    def cell(xt, hp, wih, whh, bih, bhh):
        gi = jnp.dot(xt.astype(wdtype), q(wih).T, preferred_element_type=f32) + bih
        gh = jnp.dot(hp.astype(wdtype), q(whh).T, preferred_element_type=f32) + bhh
        r = jax.nn.sigmoid(gi[:, :h] + gh[:, :h])
        z = jax.nn.sigmoid(gi[:, h:2 * h] + gh[:, h:2 * h])
        n = jnp.tanh(gi[:, 2 * h:] + r * gh[:, 2 * h:])
        return (1 - z) * n + z * hp

    hf, hb = hidden[0], hidden[1]
    hb_last_t = None
    tlen = token_ids.shape[1]
    for s in range(tlen):
        hf = cell(x[:, s], hf, params["w_ih_f"], params["w_hh_f"],
                  params["b_ih_f"], params["b_hh_f"])
        hb = cell(x[:, tlen - 1 - s], hb, params["w_ih_b"], params["w_hh_b"],
                  params["b_ih_b"], params["b_hh_b"])
        if s == 0:
            hb_last_t = hb
    last = jnp.concatenate([hf, hb_last_t], axis=-1)
    logits = jnp.dot(last.astype(wdtype), q(params["w_out"]).T,
                     preferred_element_type=f32) + params["b_out"]
    return jax.nn.log_softmax(logits, axis=-1), jnp.stack([hf, hb], axis=0)


if __name__ == "__main__":
    key = jax.random.PRNGKey(0)
    k_par, k_tok, k_hid = jax.random.split(key, 3)

    N = 2 * B_BLK          # 2 grid groups x 8 sequences = 16 sequences per call
    params = init_params(k_par, H, V)
    prep = prepare_params(params)                 # one-time weight plumbing, NOT per-call
    jax.block_until_ready(prep)

    token_ids = jax.random.randint(k_tok, (N, T), 0, V, dtype=jnp.int32)
    # initHidden() is zeros; use a small nonzero hidden to exercise the h0 path too.
    hidden0 = 0.1 * jax.random.normal(k_hid, (2, N, H), jnp.float32)

    logp, hidden_out = decoder_rnn_forward(token_ids, hidden0, prep)
    jax.block_until_ready((logp, hidden_out))

    # Tight check against a reference that uses the same bf16 weights / bf16 dot inputs.
    ref_logp_bf, ref_hid_bf = _reference_forward(token_ids, hidden0, params, jnp.bfloat16)
    np.testing.assert_allclose(np.asarray(logp), np.asarray(ref_logp_bf), rtol=1e-2, atol=1e-2)
    np.testing.assert_allclose(np.asarray(hidden_out), np.asarray(ref_hid_bf), rtol=1e-2, atol=1e-2)

    # Loose sanity check against the exact f32 module math (bf16-weight drift only).
    ref_logp, ref_hid = _reference_forward(token_ids, hidden0, params, jnp.float32)
    np.testing.assert_allclose(np.asarray(logp), np.asarray(ref_logp), rtol=0.0, atol=0.1)
    np.testing.assert_allclose(np.asarray(hidden_out), np.asarray(ref_hid), rtol=0.0, atol=0.1)

    assert logp.shape == (N, V) and hidden_out.shape == (2, N, H)
    print("KERNEL_OK")
</pallas_src>

<mosaic_0001>
module attributes {stable_mosaic.version = 11 : i64} {
  func.func @decoder_kernel(%arg0: i32, %arg1: memref<1x64x1xi32, #tpu.memory_space<vmem>>, %arg2: memref<8x64xf32, #tpu.memory_space<vmem>>, %arg3: memref<64x32xbf16, #tpu.memory_space<vmem>>, %arg4: memref<32x384xbf16, #tpu.memory_space<vmem>>, %arg5: memref<1x192xf32, #tpu.memory_space<vmem>>, %arg6: memref<64x192xbf16, #tpu.memory_space<vmem>>, %arg7: memref<1x64xf32, #tpu.memory_space<vmem>>, %arg8: memref<64x128xbf16, #tpu.memory_space<vmem>>, %arg9: memref<1x128xf32, #tpu.memory_space<vmem>>, %arg10: memref<8x128xf32, #tpu.memory_space<vmem>>, %arg11: memref<8x64xf32, #tpu.memory_space<vmem>>) attributes {dimension_semantics = [#tpu.dimension_semantics<parallel>], iteration_bounds = array<i64: 2>, scalar_prefetch = 0 : i64, scratch_operands = 0 : i64, tpu.core_type = #tpu.core_type<tc>, window_params = [{transform_indices = @transform_0, window_bounds = array<i64: 1, 64, 1>}, {transform_indices = @transform_1, window_bounds = array<i64: 8, 64>}, {pipeline_mode = #tpu.pipeline_mode<synchronous>, transform_indices = @transform_2, window_bounds = array<i64: 64, 32>}, {pipeline_mode = #tpu.pipeline_mode<synchronous>, transform_indices = @transform_3, window_bounds = array<i64: 32, 384>}, {pipeline_mode = #tpu.pipeline_mode<synchronous>, transform_indices = @transform_4, window_bounds = array<i64: 1, 192>}, {pipeline_mode = #tpu.pipeline_mode<synchronous>, transform_indices = @transform_5, window_bounds = array<i64: 64, 192>}, {pipeline_mode = #tpu.pipeline_mode<synchronous>, transform_indices = @transform_6, window_bounds = array<i64: 1, 64>}, {pipeline_mode = #tpu.pipeline_mode<synchronous>, transform_indices = @transform_7, window_bounds = array<i64: 64, 128>}, {pipeline_mode = #tpu.pipeline_mode<synchronous>, transform_indices = @transform_8, window_bounds = array<i64: 1, 128>}, {transform_indices = @transform_9, window_bounds = array<i64: 8, 128>}, {transform_indices = @transform_10, window_bounds = array<i64: 8, 64>}]} {
    %c0 = arith.constant 0 : index
    %c0_0 = arith.constant 0 : index
    %c0_1 = arith.constant 0 : index
    %0 = vector.load %arg1[%c0, %c0_0, %c0_1] : memref<1x64x1xi32, #tpu.memory_space<vmem>>, vector<1x64x1xi32>
    %1 = vector.shape_cast %0 : vector<1x64x1xi32> to vector<64x1xi32>
    %2 = tpu.iota {dimensions = array<i32: 1>} : vector<64x64xi32>
    %3 = vector.broadcast %1 : vector<64x1xi32> to vector<64x64xi32>
    %4 = arith.cmpi eq, %2, %3 : vector<64x64xi32>
    %5 = arith.extui %4 : vector<64x64xi1> to vector<64x64xi32>
    %6 = arith.sitofp %5 : vector<64x64xi32> to vector<64x64xf32>
    %7 = arith.truncf %6 : vector<64x64xf32> to vector<64x64xbf16>
    %c0_2 = arith.constant 0 : index
    %c0_3 = arith.constant 0 : index
    %8 = vector.load %arg3[%c0_2, %c0_3] : memref<64x32xbf16, #tpu.memory_space<vmem>>, vector<64x32xbf16>
    %cst = arith.constant dense<0.000000e+00> : vector<64x32xf32>
    %9 = tpu.matmul %7, %8, %cst {dimension_numbers = #tpu.dot_dimension_numbers<[1], [0], [0], [1], [0, 0, 1, 1], [], []>} : vector<64x64xbf16>, vector<64x32xbf16>, vector<64x32xf32> -> vector<64x32xf32>
    %cst_4 = arith.constant 0.000000e+00 : f32
    %10 = vector.broadcast %cst_4 : f32 to vector<64x32xf32>
    %11 = arith.maximumf %9, %10 : vector<64x32xf32>
    %12 = arith.truncf %11 : vector<64x32xf32> to vector<64x32xbf16>
    %c0_5 = arith.constant 0 : index
    %c0_6 = arith.constant 0 : index
    %13 = vector.load %arg4[%c0_5, %c0_6] : memref<32x384xbf16, #tpu.memory_space<vmem>>, vector<32x384xbf16>
    %cst_7 = arith.constant dense<0.000000e+00> : vector<64x384xf32>
    %14 = tpu.matmul %12, %13, %cst_7 {dimension_numbers = #tpu.dot_dimension_numbers<[1], [0], [0], [1], [0, 0, 1, 1], [], []>} : vector<64x32xbf16>, vector<32x384xbf16>, vector<64x384xf32> -> vector<64x384xf32>
    %15 = vector.extract_strided_slice %14 {offsets = [0, 0], sizes = [64, 192], strides = [1, 1]} : vector<64x384xf32> to vector<64x192xf32>
    %c0_8 = arith.constant 0 : index
    %c0_9 = arith.constant 0 : index
    %16 = vector.load %arg5[%c0_8, %c0_9] : memref<1x192xf32, #tpu.memory_space<vmem>>, vector<1x192xf32>
    %17 = vector.broadcast %16 : vector<1x192xf32> to vector<64x192xf32>
    %18 = arith.addf %15, %17 : vector<64x192xf32>
    %19 = vector.extract_strided_slice %14 {offsets = [0, 192], sizes = [64, 192], strides = [1, 1]} : vector<64x384xf32> to vector<64x192xf32>
    %c0_10 = arith.constant 0 : index
    %c0_11 = arith.constant 0 : index
    %20 = vector.load %arg6[%c0_10, %c0_11] : memref<64x192xbf16, #tpu.memory_space<vmem>>, vector<64x192xbf16>
    %c0_12 = arith.constant 0 : index
    %c0_13 = arith.constant 0 : index
    %21 = vector.load %arg7[%c0_12, %c0_13] : memref<1x64xf32, #tpu.memory_space<vmem>>, vector<1x64xf32>
    %c0_14 = arith.constant 0 : index
    %c0_15 = arith.constant 0 : index
    %22 = vector.load %arg2[%c0_14, %c0_15] : memref<8x64xf32, #tpu.memory_space<vmem>>, vector<8x64xf32>
    %23 = vector.extract_strided_slice %18 {offsets = [0, 0], sizes = [8, 192], strides = [1, 1]} : vector<64x192xf32> to vector<8x192xf32>
    %24 = vector.extract_strided_slice %19 {offsets = [56, 0], sizes = [8, 192], strides = [1, 1]} : vector<64x192xf32> to vector<8x192xf32>
    %25 = arith.addf %23, %24 : vector<8x192xf32>
    %26 = arith.truncf %22 : vector<8x64xf32> to vector<8x64xbf16>
    %cst_16 = arith.constant dense<0.000000e+00> : vector<8x192xf32>
    %27 = tpu.matmul %26, %20, %cst_16 {dimension_numbers = #tpu.dot_dimension_numbers<[1], [0], [0], [1], [0, 0, 1, 1], [], []>} : vector<8x64xbf16>, vector<64x192xbf16>, vector<8x192xf32> -> vector<8x192xf32>
    %28 = vector.extract_strided_slice %25 {offsets = [0, 0], sizes = [8, 128], strides = [1, 1]} : vector<8x192xf32> to vector<8x128xf32>
    %29 = vector.extract_strided_slice %27 {offsets = [0, 0], sizes = [8, 128], strides = [1, 1]} : vector<8x192xf32> to vector<8x128xf32>
    %30 = arith.addf %28, %29 : vector<8x128xf32>
    %31 = arith.negf %30 : vector<8x128xf32>
    %32 = math.exp %31 : vector<8x128xf32>
    %cst_17 = arith.constant 1.000000e+00 : f32
    %33 = vector.broadcast %cst_17 : f32 to vector<8x128xf32>
    %34 = arith.addf %33, %32 : vector<8x128xf32>
    %35 = arith.divf %33, %34 : vector<8x128xf32>
    %36 = vector.extract_strided_slice %35 {offsets = [0, 0], sizes = [8, 64], strides = [1, 1]} : vector<8x128xf32> to vector<8x64xf32>
    %37 = vector.extract_strided_slice %35 {offsets = [0, 64], sizes = [8, 64], strides = [1, 1]} : vector<8x128xf32> to vector<8x64xf32>
    %38 = vector.extract_strided_slice %25 {offsets = [0, 128], sizes = [8, 64], strides = [1, 1]} : vector<8x192xf32> to vector<8x64xf32>
    %39 = vector.extract_strided_slice %27 {offsets = [0, 128], sizes = [8, 64], strides = [1, 1]} : vector<8x192xf32> to vector<8x64xf32>
    %40 = vector.broadcast %21 : vector<1x64xf32> to vector<8x64xf32>
    %41 = arith.addf %39, %40 : vector<8x64xf32>
    %42 = arith.mulf %36, %41 : vector<8x64xf32>
    %43 = arith.addf %38, %42 : vector<8x64xf32>
    %44 = math.tanh %43 : vector<8x64xf32>
    %cst_18 = arith.constant 1.000000e+00 : f32
    %45 = vector.broadcast %cst_18 : f32 to vector<8x64xf32>
    %46 = arith.subf %45, %37 : vector<8x64xf32>
    %47 = arith.mulf %46, %44 : vector<8x64xf32>
    %48 = arith.mulf %37, %22 : vector<8x64xf32>
    %49 = arith.addf %47, %48 : vector<8x64xf32>
    %50 = vector.extract_strided_slice %18 {offsets = [8, 0], sizes = [8, 192], strides = [1, 1]} : vector<64x192xf32> to vector<8x192xf32>
    %51 = vector.extract_strided_slice %19 {offsets = [48, 0], sizes = [8, 192], strides = [1, 1]} : vector<64x192xf32> to vector<8x192xf32>
    %52 = arith.addf %50, %51 : vector<8x192xf32>
    %53 = arith.truncf %49 : vector<8x64xf32> to vector<8x64xbf16>
    %cst_19 = arith.constant dense<0.000000e+00> : vector<8x192xf32>
    %54 = tpu.matmul %53, %20, %cst_19 {dimension_numbers = #tpu.dot_dimension_numbers<[1], [0], [0], [1], [0, 0, 1, 1], [], []>} : vector<8x64xbf16>, vector<64x192xbf16>, vector<8x192xf32> -> vector<8x192xf32>
    %55 = vector.extract_strided_slice %52 {offsets = [0, 0], sizes = [8, 128], strides = [1, 1]} : vector<8x192xf32> to vector<8x128xf32>
    %56 = vector.extract_strided_slice %54 {offsets = [0, 0], sizes = [8, 128], strides = [1, 1]} : vector<8x192xf32> to vector<8x128xf32>
    %57 = arith.addf %55, %56 : vector<8x128xf32>
    %58 = arith.negf %57 : vector<8x128xf32>
    %59 = math.exp %58 : vector<8x128xf32>
    %cst_20 = arith.constant 1.000000e+00 : f32
    %60 = vector.broadcast %cst_20 : f32 to vector<8x128xf32>
    %61 = arith.addf %60, %59 : vector<8x128xf32>
    %62 = arith.divf %60, %61 : vector<8x128xf32>
    %63 = vector.extract_strided_slice %62 {offsets = [0, 0], sizes = [8, 64], strides = [1, 1]} : vector<8x128xf32> to vector<8x64xf32>
    %64 = vector.extract_strided_slice %62 {offsets = [0, 64], sizes = [8, 64], strides = [1, 1]} : vector<8x128xf32> to vector<8x64xf32>
    %65 = vector.extract_strided_slice %52 {offsets = [0, 128], sizes = [8, 64], strides = [1, 1]} : vector<8x192xf32> to vector<8x64xf32>
    %66 = vector.extract_strided_slice %54 {offsets = [0, 128], sizes = [8, 64], strides = [1, 1]} : vector<8x192xf32> to vector<8x64xf32>
    %67 = vector.broadcast %21 : vector<1x64xf32> to vector<8x64xf32>
    %68 = arith.addf %66, %67 : vector<8x64xf32>
    %69 = arith.mulf %63, %68 : vector<8x64xf32>
    %70 = arith.addf %65, %69 : vector<8x64xf32>
    %71 = math.tanh %70 : vector<8x64xf32>
    %cst_21 = arith.constant 1.000000e+00 : f32
    %72 = vector.broadcast %cst_21 : f32 to vector<8x64xf32>
    %73 = arith.subf %72, %64 : vector<8x64xf32>
    %74 = arith.mulf %73, %71 : vector<8x64xf32>
    %75 = arith.mulf %64, %49 : vector<8x64xf32>
    %76 = arith.addf %74, %75 : vector<8x64xf32>
    %77 = vector.extract_strided_slice %18 {offsets = [16, 0], sizes = [8, 192], strides = [1, 1]} : vector<64x192xf32> to vector<8x192xf32>
    %78 = vector.extract_strided_slice %19 {offsets = [40, 0], sizes = [8, 192], strides = [1, 1]} : vector<64x192xf32> to vector<8x192xf32>
    %79 = arith.addf %77, %78 : vector<8x192xf32>
    %80 = arith.truncf %76 : vector<8x64xf32> to vector<8x64xbf16>
    %cst_22 = arith.constant dense<0.000000e+00> : vector<8x192xf32>
    %81 = tpu.matmul %80, %20, %cst_22 {dimension_numbers = #tpu.dot_dimension_numbers<[1], [0], [0], [1], [0, 0, 1, 1], [], []>} : vector<8x64xbf16>, vector<64x192xbf16>, vector<8x192xf32> -> vector<8x192xf32>
    %82 = vector.extract_strided_slice %79 {offsets = [0, 0], sizes = [8, 128], strides = [1, 1]} : vector<8x192xf32> to vector<8x128xf32>
    %83 = vector.extract_strided_slice %81 {offsets = [0, 0], sizes = [8, 128], strides = [1, 1]} : vector<8x192xf32> to vector<8x128xf32>
    %84 = arith.addf %82, %83 : vector<8x128xf32>
    %85 = arith.negf %84 : vector<8x128xf32>
    %86 = math.exp %85 : vector<8x128xf32>
    %cst_23 = arith.constant 1.000000e+00 : f32
    %87 = vector.broadcast %cst_23 : f32 to vector<8x128xf32>
    %88 = arith.addf %87, %86 : vector<8x128xf32>
    %89 = arith.divf %87, %88 : vector<8x128xf32>
    %90 = vector.extract_strided_slice %89 {offsets = [0, 0], sizes = [8, 64], strides = [1, 1]} : vector<8x128xf32> to vector<8x64xf32>
    %91 = vector.extract_strided_slice %89 {offsets = [0, 64], sizes = [8, 64], strides = [1, 1]} : vector<8x128xf32> to vector<8x64xf32>
    %92 = vector.extract_strided_slice %79 {offsets = [0, 128], sizes = [8, 64], strides = [1, 1]} : vector<8x192xf32> to vector<8x64xf32>
    %93 = vector.extract_strided_slice %81 {offsets = [0, 128], sizes = [8, 64], strides = [1, 1]} : vector<8x192xf32> to vector<8x64xf32>
    %94 = vector.broadcast %21 : vector<1x64xf32> to vector<8x64xf32>
    %95 = arith.addf %93, %94 : vector<8x64xf32>
    %96 = arith.mulf %90, %95 : vector<8x64xf32>
    %97 = arith.addf %92, %96 : vector<8x64xf32>
    %98 = math.tanh %97 : vector<8x64xf32>
    %cst_24 = arith.constant 1.000000e+00 : f32
    %99 = vector.broadcast %cst_24 : f32 to vector<8x64xf32>
    %100 = arith.subf %99, %91 : vector<8x64xf32>
    %101 = arith.mulf %100, %98 : vector<8x64xf32>
    %102 = arith.mulf %91, %76 : vector<8x64xf32>
    %103 = arith.addf %101, %102 : vector<8x64xf32>
    %104 = vector.extract_strided_slice %18 {offsets = [24, 0], sizes = [8, 192], strides = [1, 1]} : vector<64x192xf32> to vector<8x192xf32>
    %105 = vector.extract_strided_slice %19 {offsets = [32, 0], sizes = [8, 192], strides = [1, 1]} : vector<64x192xf32> to vector<8x192xf32>
    %106 = arith.addf %104, %105 : vector<8x192xf32>
    %107 = arith.truncf %103 : vector<8x64xf32> to vector<8x64xbf16>
    %cst_25 = arith.constant dense<0.000000e+00> : vector<8x192xf32>
    %108 = tpu.matmul %107, %20, %cst_25 {dimension_numbers = #tpu.dot_dimension_numbers<[1], [0], [0], [1], [0, 0, 1, 1], [], []>} : vector<8x64xbf16>, vector<64x192xbf16>, vector<8x192xf32> -> vector<8x192xf32>
    %109 = vector.extract_strided_slice %106 {offsets = [0, 0], sizes = [8, 128], strides = [1, 1]} : vector<8x192xf32> to vector<8x128xf32>
    %110 = vector.extract_strided_slice %108 {offsets = [0, 0], sizes = [8, 128], strides = [1, 1]} : vector<8x192xf32> to vector<8x128xf32>
    %111 = arith.addf %109, %110 : vector<8x128xf32>
    %112 = arith.negf %111 : vector<8x128xf32>
    %113 = math.exp %112 : vector<8x128xf32>
    %cst_26 = arith.constant 1.000000e+00 : f32
    %114 = vector.broadcast %cst_26 : f32 to vector<8x128xf32>
    %115 = arith.addf %114, %113 : vector<8x128xf32>
    %116 = arith.divf %114, %115 : vector<8x128xf32>
    %117 = vector.extract_strided_slice %116 {offsets = [0, 0], sizes = [8, 64], strides = [1, 1]} : vector<8x128xf32> to vector<8x64xf32>
    %118 = vector.extract_strided_slice %116 {offsets = [0, 64], sizes = [8, 64], strides = [1, 1]} : vector<8x128xf32> to vector<8x64xf32>
    %119 = vector.extract_strided_slice %106 {offsets = [0, 128], sizes = [8, 64], strides = [1, 1]} : vector<8x192xf32> to vector<8x64xf32>
    %120 = vector.extract_strided_slice %108 {offsets = [0, 128], sizes = [8, 64], strides = [1, 1]} : vector<8x192xf32> to vector<8x64xf32>
    %121 = vector.broadcast %21 : vector<1x64xf32> to vector<8x64xf32>
    %122 = arith.addf %120, %121 : vector<8x64xf32>
    %123 = arith.mulf %117, %122 : vector<8x64xf32>
    %124 = arith.addf %119, %123 : vector<8x64xf32>
    %125 = math.tanh %124 : vector<8x64xf32>
    %cst_27 = arith.constant 1.000000e+00 : f32
    %126 = vector.broadcast %cst_27 : f32 to vector<8x64xf32>
    %127 = arith.subf %126, %118 : vector<8x64xf32>
    %128 = arith.mulf %127, %125 : vector<8x64xf32>
    %129 = arith.mulf %118, %103 : vector<8x64xf32>
    %130 = arith.addf %128, %129 : vector<8x64xf32>
    %131 = vector.extract_strided_slice %18 {offsets = [32, 0], sizes = [8, 192], strides = [1, 1]} : vector<64x192xf32> to vector<8x192xf32>
    %132 = vector.extract_strided_slice %19 {offsets = [24, 0], sizes = [8, 192], strides = [1, 1]} : vector<64x192xf32> to vector<8x192xf32>
    %133 = arith.addf %131, %132 : vector<8x192xf32>
    %134 = arith.truncf %130 : vector<8x64xf32> to vector<8x64xbf16>
    %cst_28 = arith.constant dense<0.000000e+00> : vector<8x192xf32>
    %135 = tpu.matmul %134, %20, %cst_28 {dimension_numbers = #tpu.dot_dimension_numbers<[1], [0], [0], [1], [0, 0, 1, 1], [], []>} : vector<8x64xbf16>, vector<64x192xbf16>, vector<8x192xf32> -> vector<8x192xf32>
    %136 = vector.extract_strided_slice %133 {offsets = [0, 0], sizes = [8, 128], strides = [1, 1]} : vector<8x192xf32> to vector<8x128xf32>
    %137 = vector.extract_strided_slice %135 {offsets = [0, 0], sizes = [8, 128], strides = [1, 1]} : vector<8x192xf32> to vector<8x128xf32>
    %138 = arith.addf %136, %137 : vector<8x128xf32>
    %139 = arith.negf %138 : vector<8x128xf32>
    %140 = math.exp %139 : vector<8x128xf32>
    %cst_29 = arith.constant 1.000000e+00 : f32
    %141 = vector.broadcast %cst_29 : f32 to vector<8x128xf32>
    %142 = arith.addf %141, %140 : vector<8x128xf32>
    %143 = arith.divf %141, %142 : vector<8x128xf32>
    %144 = vector.extract_strided_slice %143 {offsets = [0, 0], sizes = [8, 64], strides = [1, 1]} : vector<8x128xf32> to vector<8x64xf32>
    %145 = vector.extract_strided_slice %143 {offsets = [0, 64], sizes = [8, 64], strides = [1, 1]} : vector<8x128xf32> to vector<8x64xf32>
    %146 = vector.extract_strided_slice %133 {offsets = [0, 128], sizes = [8, 64], strides = [1, 1]} : vector<8x192xf32> to vector<8x64xf32>
    %147 = vector.extract_strided_slice %135 {offsets = [0, 128], sizes = [8, 64], strides = [1, 1]} : vector<8x192xf32> to vector<8x64xf32>
    %148 = vector.broadcast %21 : vector<1x64xf32> to vector<8x64xf32>
    %149 = arith.addf %147, %148 : vector<8x64xf32>
    %150 = arith.mulf %144, %149 : vector<8x64xf32>
    %151 = arith.addf %146, %150 : vector<8x64xf32>
    %152 = math.tanh %151 : vector<8x64xf32>
    %cst_30 = arith.constant 1.000000e+00 : f32
    %153 = vector.broadcast %cst_30 : f32 to vector<8x64xf32>
    %154 = arith.subf %153, %145 : vector<8x64xf32>
    %155 = arith.mulf %154, %152 : vector<8x64xf32>
    %156 = arith.mulf %145, %130 : vector<8x64xf32>
    %157 = arith.addf %155, %156 : vector<8x64xf32>
    %158 = vector.extract_strided_slice %18 {offsets = [40, 0], sizes = [8, 192], strides = [1, 1]} : vector<64x192xf32> to vector<8x192xf32>
    %159 = vector.extract_strided_slice %19 {offsets = [16, 0], sizes = [8, 192], strides = [1, 1]} : vector<64x192xf32> to vector<8x192xf32>
    %160 = arith.addf %158, %159 : vector<8x192xf32>
    %161 = arith.truncf %157 : vector<8x64xf32> to vector<8x64xbf16>
    %cst_31 = arith.constant dense<0.000000e+00> : vector<8x192xf32>
    %162 = tpu.matmul %161, %20, %cst_31 {dimension_numbers = #tpu.dot_dimension_numbers<[1], [0], [0], [1], [0, 0, 1, 1], [], []>} : vector<8x64xbf16>, vector<64x192xbf16>, vector<8x192xf32> -> vector<8x192xf32>
    %163 = vector.extract_strided_slice %160 {offsets = [0, 0], sizes = [8, 128], strides = [1, 1]} : vector<8x192xf32> to vector<8x128xf32>
    %164 = vector.extract_strided_slice %162 {offsets = [0, 0], sizes = [8, 128], strides = [1, 1]} : vector<8x192xf32> to vector<8x128xf32>
    %165 = arith.addf %163, %164 : vector<8x128xf32>
    %166 = arith.negf %165 : vector<8x128xf32>
    %167 = math.exp %166 : vector<8x128xf32>
    %cst_32 = arith.constant 1.000000e+00 : f32
    %168 = vector.broadcast %cst_32 : f32 to vector<8x128xf32>
    %169 = arith.addf %168, %167 : vector<8x128xf32>
    %170 = arith.divf %168, %169 : vector<8x128xf32>
    %171 = vector.extract_strided_slice %170 {offsets = [0, 0], sizes = [8, 64], strides = [1, 1]} : vector<8x128xf32> to vector<8x64xf32>
    %172 = vector.extract_strided_slice %170 {offsets = [0, 64], sizes = [8, 64], strides = [1, 1]} : vector<8x128xf32> to vector<8x64xf32>
    %173 = vector.extract_strided_slice %160 {offsets = [0, 128], sizes = [8, 64], strides = [1, 1]} : vector<8x192xf32> to vector<8x64xf32>
    %174 = vector.extract_strided_slice %162 {offsets = [0, 128], sizes = [8, 64], strides = [1, 1]} : vector<8x192xf32> to vector<8x64xf32>
    %175 = vector.broadcast %21 : vector<1x64xf32> to vector<8x64xf32>
    %176 = arith.addf %174, %175 : vector<8x64xf32>
    %177 = arith.mulf %171, %176 : vector<8x64xf32>
    %178 = arith.addf %173, %177 : vector<8x64xf32>
    %179 = math.tanh %178 : vector<8x64xf32>
    %cst_33 = arith.constant 1.000000e+00 : f32
    %180 = vector.broadcast %cst_33 : f32 to vector<8x64xf32>
    %181 = arith.subf %180, %172 : vector<8x64xf32>
    %182 = arith.mulf %181, %179 : vector<8x64xf32>
    %183 = arith.mulf %172, %157 : vector<8x64xf32>
    %184 = arith.addf %182, %183 : vector<8x64xf32>
    %185 = vector.extract_strided_slice %18 {offsets = [48, 0], sizes = [8, 192], strides = [1, 1]} : vector<64x192xf32> to vector<8x192xf32>
    %186 = vector.extract_strided_slice %19 {offsets = [8, 0], sizes = [8, 192], strides = [1, 1]} : vector<64x192xf32> to vector<8x192xf32>
    %187 = arith.addf %185, %186 : vector<8x192xf32>
    %188 = arith.truncf %184 : vector<8x64xf32> to vector<8x64xbf16>
    %cst_34 = arith.constant dense<0.000000e+00> : vector<8x192xf32>
    %189 = tpu.matmul %188, %20, %cst_34 {dimension_numbers = #tpu.dot_dimension_numbers<[1], [0], [0], [1], [0, 0, 1, 1], [], []>} : vector<8x64xbf16>, vector<64x192xbf16>, vector<8x192xf32> -> vector<8x192xf32>
    %190 = vector.extract_strided_slice %187 {offsets = [0, 0], sizes = [8, 128], strides = [1, 1]} : vector<8x192xf32> to vector<8x128xf32>
    %191 = vector.extract_strided_slice %189 {offsets = [0, 0], sizes = [8, 128], strides = [1, 1]} : vector<8x192xf32> to vector<8x128xf32>
    %192 = arith.addf %190, %191 : vector<8x128xf32>
    %193 = arith.negf %192 : vector<8x128xf32>
    %194 = math.exp %193 : vector<8x128xf32>
    %cst_35 = arith.constant 1.000000e+00 : f32
    %195 = vector.broadcast %cst_35 : f32 to vector<8x128xf32>
    %196 = arith.addf %195, %194 : vector<8x128xf32>
    %197 = arith.divf %195, %196 : vector<8x128xf32>
    %198 = vector.extract_strided_slice %197 {offsets = [0, 0], sizes = [8, 64], strides = [1, 1]} : vector<8x128xf32> to vector<8x64xf32>
    %199 = vector.extract_strided_slice %197 {offsets = [0, 64], sizes = [8, 64], strides = [1, 1]} : vector<8x128xf32> to vector<8x64xf32>
    %200 = vector.extract_strided_slice %187 {offsets = [0, 128], sizes = [8, 64], strides = [1, 1]} : vector<8x192xf32> to vector<8x64xf32>
    %201 = vector.extract_strided_slice %189 {offsets = [0, 128], sizes = [8, 64], strides = [1, 1]} : vector<8x192xf32> to vector<8x64xf32>
    %202 = vector.broadcast %21 : vector<1x64xf32> to vector<8x64xf32>
    %203 = arith.addf %201, %202 : vector<8x64xf32>
    %204 = arith.mulf %198, %203 : vector<8x64xf32>
    %205 = arith.addf %200, %204 : vector<8x64xf32>
    %206 = math.tanh %205 : vector<8x64xf32>
    %cst_36 = arith.constant 1.000000e+00 : f32
    %207 = vector.broadcast %cst_36 : f32 to vector<8x64xf32>
    %208 = arith.subf %207, %199 : vector<8x64xf32>
    %209 = arith.mulf %208, %206 : vector<8x64xf32>
    %210 = arith.mulf %199, %184 : vector<8x64xf32>
    %211 = arith.addf %209, %210 : vector<8x64xf32>
    %212 = vector.extract_strided_slice %18 {offsets = [56, 0], sizes = [8, 192], strides = [1, 1]} : vector<64x192xf32> to vector<8x192xf32>
    %213 = vector.extract_strided_slice %19 {offsets = [0, 0], sizes = [8, 192], strides = [1, 1]} : vector<64x192xf32> to vector<8x192xf32>
    %214 = arith.addf %212, %213 : vector<8x192xf32>
    %215 = arith.truncf %211 : vector<8x64xf32> to vector<8x64xbf16>
    %cst_37 = arith.constant dense<0.000000e+00> : vector<8x192xf32>
    %216 = tpu.matmul %215, %20, %cst_37 {dimension_numbers = #tpu.dot_dimension_numbers<[1], [0], [0], [1], [0, 0, 1, 1], [], []>} : vector<8x64xbf16>, vector<64x192xbf16>, vector<8x192xf32> -> vector<8x192xf32>
    %217 = vector.extract_strided_slice %214 {offsets = [0, 0], sizes = [8, 128], strides = [1, 1]} : vector<8x192xf32> to vector<8x128xf32>
    %218 = vector.extract_strided_slice %216 {offsets = [0, 0], sizes = [8, 128], strides = [1, 1]} : vector<8x192xf32> to vector<8x128xf32>
    %219 = arith.addf %217, %218 : vector<8x128xf32>
    %220 = arith.negf %219 : vector<8x128xf32>
    %221 = math.exp %220 : vector<8x128xf32>
    %cst_38 = arith.constant 1.000000e+00 : f32
    %222 = vector.broadcast %cst_38 : f32 to vector<8x128xf32>
    %223 = arith.addf %222, %221 : vector<8x128xf32>
    %224 = arith.divf %222, %223 : vector<8x128xf32>
    %225 = vector.extract_strided_slice %224 {offsets = [0, 0], sizes = [8, 64], strides = [1, 1]} : vector<8x128xf32> to vector<8x64xf32>
    %226 = vector.extract_strided_slice %224 {offsets = [0, 64], sizes = [8, 64], strides = [1, 1]} : vector<8x128xf32> to vector<8x64xf32>
    %227 = vector.extract_strided_slice %214 {offsets = [0, 128], sizes = [8, 64], strides = [1, 1]} : vector<8x192xf32> to vector<8x64xf32>
    %228 = vector.extract_strided_slice %216 {offsets = [0, 128], sizes = [8, 64], strides = [1, 1]} : vector<8x192xf32> to vector<8x64xf32>
    %229 = vector.broadcast %21 : vector<1x64xf32> to vector<8x64xf32>
    %230 = arith.addf %228, %229 : vector<8x64xf32>
    %231 = arith.mulf %225, %230 : vector<8x64xf32>
    %232 = arith.addf %227, %231 : vector<8x64xf32>
    %233 = math.tanh %232 : vector<8x64xf32>
    %cst_39 = arith.constant 1.000000e+00 : f32
    %234 = vector.broadcast %cst_39 : f32 to vector<8x64xf32>
    %235 = arith.subf %234, %226 : vector<8x64xf32>
    %236 = arith.mulf %235, %233 : vector<8x64xf32>
    %237 = arith.mulf %226, %211 : vector<8x64xf32>
    %238 = arith.addf %236, %237 : vector<8x64xf32>
    %239 = tpu.iota {dimensions = array<i32: 1>} : vector<8x64xi32>
    %c32_i32 = arith.constant 32 : i32
    %240 = vector.broadcast %c32_i32 : i32 to vector<8x64xi32>
    %241 = arith.cmpi slt, %239, %240 : vector<8x64xi32>
    %242 = arith.select %241, %238, %49 : vector<8x64xi1>, vector<8x64xf32>
    %243 = arith.truncf %242 : vector<8x64xf32> to vector<8x64xbf16>
    %c0_40 = arith.constant 0 : index
    %c0_41 = arith.constant 0 : index
    %244 = vector.load %arg8[%c0_40, %c0_41] : memref<64x128xbf16, #tpu.memory_space<vmem>>, vector<64x128xbf16>
    %cst_42 = arith.constant dense<0.000000e+00> : vector<8x128xf32>
    %245 = tpu.matmul %243, %244, %cst_42 {dimension_numbers = #tpu.dot_dimension_numbers<[1], [0], [0], [1], [0, 0, 1, 1], [], []>} : vector<8x64xbf16>, vector<64x128xbf16>, vector<8x128xf32> -> vector<8x128xf32>
    %c0_43 = arith.constant 0 : index
    %c0_44 = arith.constant 0 : index
    %246 = vector.load %arg9[%c0_43, %c0_44] : memref<1x128xf32, #tpu.memory_space<vmem>>, vector<1x128xf32>
    %247 = vector.broadcast %246 : vector<1x128xf32> to vector<8x128xf32>
    %248 = arith.addf %245, %247 : vector<8x128xf32>
    %cst_45 = arith.constant dense<0xFF800000> : vector<8xf32>
    %249 = vector.multi_reduction <maximumf>, %248, %cst_45 [1] : vector<8x128xf32> to vector<8xf32>
    %250 = vector.shape_cast %249 : vector<8xf32> to vector<8x1xf32>
    %251 = vector.broadcast %250 : vector<8x1xf32> to vector<8x128xf32>
    %252 = arith.subf %248, %251 : vector<8x128xf32>
    %253 = math.exp %252 : vector<8x128xf32>
    %cst_46 = arith.constant dense<0.000000e+00> : vector<8xf32>
    %254 = vector.multi_reduction <add>, %253, %cst_46 [1] : vector<8x128xf32> to vector<8xf32>
    %255 = vector.shape_cast %254 : vector<8xf32> to vector<8x1xf32>
    %256 = math.log %255 : vector<8x1xf32>
    %257 = arith.addf %256, %250 : vector<8x1xf32>
    %258 = vector.broadcast %257 : vector<8x1xf32> to vector<8x128xf32>
    %259 = arith.subf %248, %258 : vector<8x128xf32>
    %c0_47 = arith.constant 0 : index
    %c0_48 = arith.constant 0 : index
    %260 = vector.load %arg10[%c0_47, %c0_48] : memref<8x128xf32, #tpu.memory_space<vmem>>, vector<8x128xf32>
    tpu.vector_store %arg10[%c0_47, %c0_48], %259 {strides = array<i32>} : memref<8x128xf32, #tpu.memory_space<vmem>>, vector<8x128xf32>,
    %c0_49 = arith.constant 0 : index
    %c0_50 = arith.constant 0 : index
    %261 = vector.load %arg11[%c0_49, %c0_50] : memref<8x64xf32, #tpu.memory_space<vmem>>, vector<8x64xf32>
    tpu.vector_store %arg11[%c0_49, %c0_50], %238 {strides = array<i32>} : memref<8x64xf32, #tpu.memory_space<vmem>>, vector<8x64xf32>,
    return
  }
  func.func @transform_0(%arg0: i32) -> (i32, i32, i32) {
    %c0_i32 = arith.constant 0 : i32
    %c0_i32_0 = arith.constant 0 : i32
    %c0_i32_1 = arith.constant 0 : i32
    return %arg0, %c0_i32, %c0_i32_0 : i32, i32, i32
  }
  func.func @transform_1(%arg0: i32) -> (i32, i32) {
    %c0_i32 = arith.constant 0 : i32
    %c0_i32_0 = arith.constant 0 : i32
    return %arg0, %c0_i32 : i32, i32
  }
  func.func @transform_2(%arg0: i32) -> (i32, i32) {
    %c0_i32 = arith.constant 0 : i32
    %c0_i32_0 = arith.constant 0 : i32
    %c0_i32_1 = arith.constant 0 : i32
    return %c0_i32, %c0_i32_0 : i32, i32
  }
  func.func @transform_3(%arg0: i32) -> (i32, i32) {
    %c0_i32 = arith.constant 0 : i32
    %c0_i32_0 = arith.constant 0 : i32
    %c0_i32_1 = arith.constant 0 : i32
    return %c0_i32, %c0_i32_0 : i32, i32
  }
  func.func @transform_4(%arg0: i32) -> (i32, i32) {
    %c0_i32 = arith.constant 0 : i32
    %c0_i32_0 = arith.constant 0 : i32
    %c0_i32_1 = arith.constant 0 : i32
    return %c0_i32, %c0_i32_0 : i32, i32
  }
  func.func @transform_5(%arg0: i32) -> (i32, i32) {
    %c0_i32 = arith.constant 0 : i32
    %c0_i32_0 = arith.constant 0 : i32
    %c0_i32_1 = arith.constant 0 : i32
    return %c0_i32, %c0_i32_0 : i32, i32
  }
  func.func @transform_6(%arg0: i32) -> (i32, i32) {
    %c0_i32 = arith.constant 0 : i32
    %c0_i32_0 = arith.constant 0 : i32
    %c0_i32_1 = arith.constant 0 : i32
    return %c0_i32, %c0_i32_0 : i32, i32
  }
  func.func @transform_7(%arg0: i32) -> (i32, i32) {
    %c0_i32 = arith.constant 0 : i32
    %c0_i32_0 = arith.constant 0 : i32
    %c0_i32_1 = arith.constant 0 : i32
    return %c0_i32, %c0_i32_0 : i32, i32
  }
  func.func @transform_8(%arg0: i32) -> (i32, i32) {
    %c0_i32 = arith.constant 0 : i32
    %c0_i32_0 = arith.constant 0 : i32
    %c0_i32_1 = arith.constant 0 : i32
    return %c0_i32, %c0_i32_0 : i32, i32
  }
  func.func @transform_9(%arg0: i32) -> (i32, i32) {
    %c0_i32 = arith.constant 0 : i32
    %c0_i32_0 = arith.constant 0 : i32
    return %arg0, %c0_i32 : i32, i32
  }
  func.func @transform_10(%arg0: i32) -> (i32, i32) {
    %c0_i32 = arith.constant 0 : i32
    %c0_i32_0 = arith.constant 0 : i32
    return %arg0, %c0_i32 : i32, i32
  }
}

</mosaic_0001>

<bundles_post_ra>
// kernel: decoder_rnn_forward.1
= control target key start
LH: loop header
LB: loop body
LE: loop exit
PB: predicated region body
PF: predicated region fallthrough
CT: control target
= control target key end

     0   :  { %s2526_s0 = inlined_call_operand.vmem [shape: s32[2,64,1], index: 0, kind: input, shape index: {}]   ;;  %s2527_s1 = inlined_call_operand.vmem [shape: f32[16,64], index: 1, kind: input, shape index: {}]   ;;  %s2528_s2 = inlined_call_operand.vmem [shape: bf16[64,32], index: 2, kind: input, shape index: {}]   ;;  %s2529_s3 = inlined_call_operand.vmem [shape: bf16[32,384], index: 3, kind: input, shape index: {}]   ;;  %s2530_s4 = inlined_call_operand.vmem [shape: f32[1,192], index: 4, kind: input, shape index: {}]   ;;  %s2531_s5 = inlined_call_operand.vmem [shape: bf16[64,192], index: 5, kind: input, shape index: {}]   ;;  %s2532_s6 = inlined_call_operand.vmem [shape: f32[1,64], index: 6, kind: input, shape index: {}]   ;;  %s2533_s7 = inlined_call_operand.vmem [shape: bf16[64,128], index: 7, kind: input, shape index: {}]   ;;  %s2534_s8 = inlined_call_operand.vmem [shape: f32[1,128], index: 8, kind: input, shape index: {}]   ;;  %s2535_s9 = inlined_call_operand.hbm [shape: f32[16,128], index: 9, kind: output, shape index: {0}]   ;;  %s2536_s10 = inlined_call_operand.vmem [shape: f32[16,64], index: 10, kind: output, shape index: {1}]  }
   0x1   :  { %2537 = sst [smem:[#allocation5_spill]] %s2526_s0 }
   0x2   :  { %16 = vsyncpa [#allocation3], 0 }
   0x3   :  { %18 = vsyncpa [#allocation3 + $0x1], 0  ;;  %s2074_s13 = smov 0   ;;  %s2076_s14 = smov 0  }
   0x4   :  { %s2078_s15 = smov 0   ;;  %s2080_s16 = smov 0  }
   0x5 LB: > { %s2095_s17 = sadd.s32 4294967295, %s2012_s16   ;;  %s1693_s18 = sadd.s32 4294967294, %s2012_s16   ;;  %s2012_s16 = sphi %s2080_s16, %s2544_s16   ;;  %s2008_s15 = sphi %s2078_s15, %s2543_s15   ;;  %s2004_s14 = sphi %s2076_s14, %s2542_s14   ;;  %s2000_s13 = sphi %s2074_s13, %s2541_s13  }
   0x6   : > { %s2099_s19 = sadd.s32 1, %s2012_s16   ;;  %s230_s20 = sadd.s32 1, %s2008_s15 }
   0x7   : > { %s227_s21 = ssub.s32 %s2012_s16, %s2099_s19  ;;  %p240_p0 = scmp.ne.s32.totalorder %s2008_s15, %s2004_s14 }
   0x8   : > { %p228_p1 = scmp.eq.s32.totalorder %s227_s21, 0  ;;  %p241_p2 = scmp.eq.s32.totalorder %s2095_s17, 1 }
   0x9   : > { %p246_p3 = scmp.ne.s32.totalorder %s2004_s14, %s2000_s13  ;;  %p247_p4 = scmp.eq.s32.totalorder %s1693_s18, 1 }
   0xa   : > { %s2110_s22 = scalar_select %p228_p1, %s2008_s15, %s230_s20  }
   0xb   : > { %p2112_p5 = por %p241_p2, %p240_p0  ;;  %p2116_p6 = por %p247_p4, %p246_p3 }
   0xc   : > { %p1696_p7 = scmp.ge.s32.totalorder %s2012_s16, 1  ;;  %p327_p8 = scmp.lt.s32.totalorder %s2012_s16, 3 }
   0xe   : > { %p328_p9 = pnand %p1696_p7, %p327_p8 }
   0xf   : > { %p373_p10 = scmp.lt.s32.totalorder (!%p328_p9), %s2095_s17, 1  ;;  %s2540_s0 = sld [smem:[#allocation5_spill]] (!%p328_p9) }
  0x10   : > { %331 = sbr.rel (%p328_p9) target bundleno = 4881 (0x1311), region = 56  ;;  %s2018_s30 = smov (!%p328_p9), [#allocation2]  }
  0x15   : > { %v2014_v0 = vmov 0   ;;  %v1872_v1 = vld [vmem:[%s2528_s2 + $0x18] sm:$0xff]   ;;  %s2129_s27 = scalar_select %p373_p10, %s2095_s17, 1  ;;  %v1873_v2 = vld [vmem:[%s2528_s2 + $0x10] sm:$0xff]   ;;  %v1874_v3 = vld [vmem:[%s2528_s2 + $0x8] sm:$0xff]   ;;  %v395_v13 = vlaneseq  ;;  %vm481_vm4 = vcmask 523264  }
  0x16   : > { %1871 = vset.pattern.permute.xlu1 %v2014_v0  ;;  %1870 = vset.pattern.permute.xlu0 %v2014_v0  ;;  %v1875_v8 = vld [vmem:[%s2528_s2] sm:$0xff]   ;;  %v2015_v19 = vmov 0.0   ;;  %v1876_v36 = vld [vmem:[%s2529_s3 + $0x1c] ss:$12 sps:$4 sm:$0xff]   ;;  %vm611_vm9 = vcmask 261120   ;;  %vm2017_vm10 = vmmov 0  }
  0x17   : > { %656 = vmatprep.mubr.bf16.mxu1 %v2014_v0  ;;  %1787 = vmatprep.subr.bf16.mxu0 %v1872_v1  ;;  %s1767_s12 = sshll.u32 %s2129_s27, 6  ;;  %v2146_v14 = vand.u32 127, %v395_v13  ;;  %v1878_v37 = vld [vmem:[%s2529_s3 + $0x18] ss:$12 sps:$4 sm:$0xff]   ;;  %v1879_v38 = vld [vmem:[%s2529_s3 + $0x20] ss:$12 sps:$4 sm:$0xff]  }
  0x18   : > { %1788 = vmatpush3.bf16.msra.mxu0 %v1872_v1  ;;  %s377_s21 = scalar_lea.vmem %s2540_s0, %s1767_s12  ;;  %636 = vmatprep.subr.bf16.mxu1 %v1876_v36  ;;  %v1880_v39 = vld [vmem:[%s2529_s3 + $0x4] ss:$12 sps:$4 sm:$0xff]   ;;  %v1882_v40 = vld [vmem:[%s2529_s3] ss:$12 sps:$4 sm:$0xff]   ;;  %v1883_v41 = vld [vmem:[%s2529_s3 + $0x8] ss:$12 sps:$4 sm:$0xff]  }
  0x19   : > { %1789 = vmatprep.subr.bf16.mxu0 %v1873_v2  ;;  %v389_v4 = vld [vmem:[%s377_s21 + $0x10] sm:$0xff]  ;;  %v387_v5 = vld [vmem:[%s377_s21] sm:$0xff]  ;;  %v390_v6 = vld [vmem:[%s377_s21 + $0x18] sm:$0xff]  ;;  %637 = vmatpush1.bf16.msra.mxu1 %v1878_v37  ;;  %s1700_s25 = sshll.u32 %s2129_s27, 3  ;;  %s2016_s12 = smov 64   ;;  %vm1471_vm11 = vcmp.lt.s32.totalorder %v2146_v14, 32 }
  0x1a   : > { %404 = vperm.xlu1 %1871, %v389_v4   ;;  %398 = vperm.xlu0 %1870, %v387_v5   ;;  %v388_v7 = vld [vmem:[%s377_s21 + $0x8] sm:$0xff]  ;;  %v391_v10 = vld [vmem:[%s377_s21 + $0x20] sm:$0xff]  ;;  %v394_v11 = vld [vmem:[%s377_s21 + $0x38] sm:$0xff]  ;;  %s381_s29 = scalar_lea.vmem %s2527_s1, %s1700_s25  ;;  %s385_s28 = scalar_lea.vmem %s2536_s10, %s1700_s25 }
  0x1b   : > { %v392_v9 = vld [vmem:[%s377_s21 + $0x28] sm:$0xff]  ;;  %v393_v12 = vld [vmem:[%s377_s21 + $0x30] sm:$0xff]  ;;  %638 = vmatprep.subr.bf16.mxu1 %v1880_v39  ;;  %s364_s27 = sand.u32 1, %s2004_s14   ;;  %s1956_s0 = sshll.u32 %s2018_s30, 4  ;;  %s1957_s0 = int_to_ptr.vmem [resolvable:$false] %s1956_s0 }
  0x1c   : > { %1790 = vmatpush3.bf16.msra.mxu0 %v1873_v2  ;;  %v2189_v42 = vld [vmem:[%s2531_s5 + $0x34] ss:$8 sps:$4 sm:$0xff]   ;;  %v2196_v53 = vld [vmem:[%s2531_s5 + $0x30] ss:$8 sps:$4 sm:$0xff]   ;;  %v2201_v56 = vld [vmem:[%s2531_s5 + $0x24] ss:$8 sps:$4 sm:$0xff]  }
  0x1d   : > { %1791 = vmatprep.subr.bf16.mxu0 %v1874_v3  ;;  %639 = vmatpush1.bf16.msra.mxu1 %v1882_v40  ;;  %v2211_v58 = vld [vmem:[%s2531_s5 + $0x20] ss:$8 sps:$4 sm:$0xff]   ;;  %v2218_v61 = vld [vmem:[%s2531_s5 + $0x14] ss:$8 sps:$4 sm:$0xff]   ;;  %v2232_v5 = vld [vmem:[%s2531_s5 + $0x4] ss:$8 sps:$4 sm:$0xff]  }
  0x1e   : > { %407 = vperm.xlu1 %1871, %v390_v6   ;;  %401 = vperm.xlu0 %1870, %v388_v7   ;;  %v2243_v6 = vld [vmem:[%s2531_s5] ss:$8 sps:$4 sm:$0xff]   ;;  %s1697_s25 = sshll.u32 %s364_s27, 3 }
  0x1f   : > { %863 = vmatprep.subr.bf16.mxu1 %v2189_v42  ;;  %v799_v7 = vld [vmem:[%s381_s29] sm:$0xff]  ;;  %s366_s11 = scalar_lea.vmem [#allocation2], %s1697_s25 }
  0x20   : > { %1792 = vmatpush3.bf16.msra.mxu0 %v1874_v3  ;;  %v2225_v3 = vld [vmem:[%s2531_s5 + $0x10] ss:$8 sps:$4 sm:$0xff]   ;;  %s1595_s18 = sshll.u32 %s366_s11, 4  ;;  %s1596_s18 = int_to_ptr.vmem [resolvable:$true] %s1595_s18 }
  0x21   : > { %1793 = vmatprep.subr.bf16.mxu0 %v1875_v8  ;;  %s1952_s29 = scalar_lea.vmem %s1596_s18, 128  ;;  %p1959_p0 = scmp.lt.s32.totalorder %s1596_s18, %s1957_s0 }
  0x22   : > { %413 = vperm.xlu1 %1871, %v392_v9   ;;  %410 = vperm.xlu0 %1870, %v391_v10   ;;  %v765_v9 = vshrl.u32 %v395_v13, 7  ;;  %p1953_p11 = scmp.ne.s32.totalorder %s1596_s18, %s1952_s29 }
  0x24   : > { %1794 = vmatpush3.bf16.msra.mxu0 %v1875_v8  ;;  %v811_v8 = vpack.c.bf16 %v799_v7, %v799_v7  ;;  %v766_v10 = vsub.s32 0, %v765_v9  ;;  %v770_v37 = vsub.s32 1, %v765_v9  ;;  %p1954_p12 = pnand %p1953_p11, %p2112_p5 }
  0x25   : > { %1803 = vmatprep.subr.bf16.mxu0 %v1879_v38 }
  0x26   : > { %419 = vperm.xlu1 %1871, %v394_v11   ;;  %416 = vperm.xlu0 %1870, %v393_v12   ;;  %v762_v12 = vld [vmem:[%s2530_s4] sm:$0x3]  ;;  %p1955_p13 = pneg %p1954_p12 }
  0x95   : > { %v405_v15 = vpop.permute.xlu1 %404  ;;  %v399_v16 = vpop.permute.xlu0 %398 }
  0x96   : > { %vm423_vm0 = vcmp.eq.s32.totalorder %v2146_v14, %v405_v15  ;;  %vm421_vm1 = vcmp.eq.s32.totalorder %v2146_v14, %v399_v16 }
  0x97   : > { %v1704_v20 = vsel %vm423_vm0, 1.0, %v2015_v19  ;;  %v1702_v21 = vsel %vm421_vm1, 1.0, %v2015_v19 }
  0x99   : > { %v408_v17 = vpop.permute.xlu1 %407  ;;  %v402_v18 = vpop.permute.xlu0 %401 }
  0x9a   : > { %vm424_vm2 = vcmp.eq.s32.totalorder %v2146_v14, %v408_v17  ;;  %vm422_vm3 = vcmp.eq.s32.totalorder %v2146_v14, %v402_v18  ;;  %v767_v17 = vrot.slane %v762_v12, %v766_v10 }
  0x9b   : > { %v1705_v22 = vsel %vm424_vm2, 1.0, %v2015_v19  ;;  %v1703_v23 = vsel %vm422_vm3, 1.0, %v2015_v19 }
  0x9c   : > { %v446_v24 = vpack.c.bf16 %v1705_v22, %v1704_v20  ;;  %v445_v25 = vpack.c.bf16 %v1703_v23, %v1702_v21 }
  0x9d   : > { %v414_v26 = vpop.permute.xlu1 %413  ;;  %v411_v27 = vpop.permute.xlu0 %410 }
  0x9e   : > { %vm426_vm5 = vcmp.eq.s32.totalorder %v2146_v14, %v414_v26  ;;  %vm425_vm6 = vcmp.eq.s32.totalorder %v2146_v14, %v411_v27  ;;  %1795 = vmatprep.mubr.msk.bf16.mxu0 %vm481_vm4, %v445_v25 }
  0x9f   : > { %v1707_v28 = vsel %vm426_vm5, 1.0, %v2015_v19  ;;  %v1706_v29 = vsel %vm425_vm6, 1.0, %v2015_v19  ;;  %1796 = vmatmul.mubr.msk.bf16.vlgmr.msra.gmra.mxu0 %vm481_vm4, %v446_v24 }
  0xa0   : > { %v447_v30 = vpack.c.bf16 %v1707_v28, %v1706_v29  ;;  %1804 = vmatpush3.bf16.msra.mxu0 %v1879_v38 }
  0xa1   : > { %v420_v31 = vpop.permute.xlu1 %419  ;;  %v417_v32 = vpop.permute.xlu0 %416  ;;  %1805 = vmatprep.subr.bf16.mxu0 %v1883_v41 }
  0xa2   : > { %vm428_vm7 = vcmp.eq.s32.totalorder %v2146_v14, %v420_v31  ;;  %vm427_vm8 = vcmp.eq.s32.totalorder %v2146_v14, %v417_v32  ;;  %1799 = vmatprep.mubr.msk.bf16.mxu0 %vm481_vm4, %v447_v30 }
  0xa3   : > { %v1709_v33 = vsel %vm428_vm7, 1.0, %v2015_v19  ;;  %v1708_v34 = vsel %vm427_vm8, 1.0, %v2015_v19 }
  0xa4   : > { %v448_v35 = vpack.c.bf16 %v1709_v33, %v1708_v34  ;;  %1806 = vmatpush3.bf16.msra.mxu0 %v1883_v41  ;;  %v2311_v41 = vrot.slane %v762_v12, %v770_v37 }
  0xa5   : > { %951 = vmatprep.subr.bf16.mxu0 %v2189_v42 }
  0xa7   : > { %1800 = vmatmul.mubr.msk.bf16.gmra.mxu0 %vm481_vm4, %v448_v35 }
 0x15f   : > { %v1797_v43 = vpop.f32.mrf.mxu0 }
 0x160   : > { %v561_v50 = vmax.f32 %v1797_v43, 0.0 }
 0x161   : > { %v528_v44 = vpop.f32.mrf.mxu0 }
 0x162   : > { %v559_v48 = vmax.f32 %v528_v44, 0.0 }
 0x163   : > { %v1798_v45 = vpop.f32.mrf.mxu0 }
 0x164   : > { %v562_v46 = vmax.f32 %v1798_v45, 0.0 }
 0x165   : > { %v531_v47 = vpop.f32.mrf.mxu0 }
 0x166   : > { %v560_v49 = vmax.f32 %v531_v47, 0.0  ;;  %v568_v54 = vpack.c.bf16 %v562_v46, %v561_v50 }
 0x167   : > { %v1801_v51 = vpop.f32.mrf.mxu0 }
 0x168   : > { %v567_v52 = vpack.c.bf16 %v560_v49, %v559_v48  ;;  %v565_v1 = vmax.f32 %v1801_v51, 0.0 }
 0x169   : > { %v544_v55 = vpop.f32.mrf.mxu0 }
 0x16a   : > { %1724 = vmatmul.mubr.msk.bf16.vlgmr.msra.gmra.mxu1 %vm611_vm9, %v567_v52  ;;  %1807 = vmatprep.mubr.msk.bf16.mxu0 %vm611_vm9, %v567_v52  ;;  %v563_v62 = vmax.f32 %v544_v55, 0.0 }
 0x16b   : > { %v1802_v57 = vpop.f32.mrf.mxu0  ;;  %1808 = vmatmul.mubr.msk.bf16.vlgmr.msra.gmra.mxu0 %vm611_vm9, %v568_v54  ;;  %666 = vmatprep.mubr.bf16.mxu1 %v2014_v0 }
 0x16c   : > { %864 = vmatpush1.bf16.msra.mxu1 %v2196_v53  ;;  %952 = vmatpush1.bf16.msra.mxu0 %v2196_v53  ;;  %v566_v59 = vmax.f32 %v1802_v57, 0.0 }
 0x16d   : > { %v547_v60 = vpop.f32.mrf.mxu0  ;;  %865 = vmatprep.subr.bf16.mxu1 %v2201_v56  ;;  %953 = vmatprep.subr.bf16.mxu0 %v2201_v56 }
 0x16e   : > { %v564_v63 = vmax.f32 %v547_v60, 0.0  ;;  %v570_v4 = vpack.c.bf16 %v566_v59, %v565_v1 }
 0x170   : > { %v569_v2 = vpack.c.bf16 %v564_v63, %v563_v62  ;;  %866 = vmatpush1.bf16.msra.mxu1 %v2211_v58  ;;  %954 = vmatpush1.bf16.msra.mxu0 %v2211_v58 }
 0x171   : > { %867 = vmatprep.subr.bf16.mxu1 %v2218_v61  ;;  %955 = vmatprep.subr.bf16.mxu0 %v2218_v61 }
 0x172   : > { %1725 = vmatmul.mubr.msk.bf16.gmra.mxu1 %vm611_vm9, %v568_v54  ;;  %1811 = vmatprep.mubr.msk.bf16.mxu0 %vm611_vm9, %v569_v2 }
 0x173   : > { %1812 = vmatmul.mubr.msk.bf16.gmra.mxu0 %vm611_vm9, %v570_v4  ;;  %676 = vmatprep.mubr.bf16.mxu1 %v2014_v0 }
 0x174   : > { %868 = vmatpush1.bf16.msra.mxu1 %v2225_v3  ;;  %956 = vmatpush1.bf16.msra.mxu0 %v2225_v3 }
 0x175   : > { %869 = vmatprep.subr.bf16.mxu1 %v2232_v5  ;;  %957 = vmatprep.subr.bf16.mxu0 %v2232_v5 }
 0x176   : > { %975 = vmatprep.mubr.bf16.mxu0 %v2014_v0 }
 0x178   : > { %870 = vmatpush1.bf16.msra.mxu1 %v2243_v6  ;;  %958 = vmatpush1.bf16.msra.mxu0 %v2243_v6 }
 0x179   : > { %1029 = vmatprep.subr.bf16.mxu1 %v2189_v42  ;;  %1107 = vmatprep.subr.bf16.mxu0 %v2189_v42 }
 0x17a   : > { %1726 = vmatmul.mubr.msk.bf16.gmra.mxu1 %vm611_vm9, %v569_v2 }
 0x17b   : > { %686 = vmatprep.mubr.bf16.mxu1 %v2014_v0 }
 0x182   : > { %1727 = vmatmul.mubr.msk.bf16.gmra.mxu1 %vm611_vm9, %v570_v4 }
 0x183   : > { %887 = vmatprep.mubr.bf16.mxu1 %v2014_v0 }
 0x18a   : > { %1740 = vmatmul.mubr.msk.bf16.vlgmr.msra.gmra.mxu1 %vm481_vm4, %v811_v8 }
 0x18b   : > { %1030 = vmatpush1.bf16.msra.mxu1 %v2196_v53  ;;  %1053 = vmatprep.mubr.bf16.mxu1 %v2014_v0 }
 0x18c   : > { %1031 = vmatprep.subr.bf16.mxu1 %v2201_v56 }
 0x18f   : > { %1032 = vmatpush1.bf16.msra.mxu1 %v2211_v58 }
 0x190   : > { %1033 = vmatprep.subr.bf16.mxu1 %v2218_v61 }
 0x193   : > { %1034 = vmatpush1.bf16.msra.mxu1 %v2225_v3 }
 0x194   : > { %1035 = vmatprep.subr.bf16.mxu1 %v2232_v5 }
 0x197   : > { %1036 = vmatpush1.bf16.msra.mxu1 %v2243_v6 }
 0x198   : > { %1185 = vmatprep.subr.bf16.mxu1 %v2189_v42 }
 0x22a   : > { %v658_v11 = vpop.f32.mrf.mxu1 }
 0x22b   : > { %v2277_v15 = vpop.f32.mrf.mxu0  ;;  %v774_v55 = vadd.f32 %v767_v17, %v658_v11 }
 0x22c   : > { %v2279_v16 = vpop.f32.mrf.mxu1 }
 0x22d   : > { %v2281_v18 = vpop.f32.mrf.mxu0  ;;  %v775_v8 = vadd.f32 %v2311_v41, %v2279_v16 }
 0x22e   : > { %v662_v20 = vpop.f32.mrf.mxu1 }
 0x22f   : > { %v2283_v21 = vadd.f32 %v767_v17, %v662_v20  ;;  %v2285_v22 = vpop.f32.mrf.mxu0 }
 0x230   : > { %v2287_v23 = vpop.f32.mrf.mxu1 }
 0x231   : > { %v2289_v13 = vpop.f32.mrf.mxu0 }
 0x232   : > { %v668_v24 = vpop.f32.mrf.mxu1 }
 0x233   : > { %v2291_v25 = vadd.f32 %v767_v17, %v668_v24  ;;  %v1813_v26 = vpop.f32.mrf.mxu0 }
 0x234   : > { %v2293_v27 = vpop.f32.mrf.mxu1 }
 0x235   : > { %v2295_v28 = vpop.f32.mrf.mxu0 }
 0x236   : > { %v672_v29 = vpop.f32.mrf.mxu1 }
 0x237   : > { %v2297_v30 = vadd.f32 %v767_v17, %v672_v29  ;;  %v1814_v31 = vpop.f32.mrf.mxu0 }
 0x238   : > { %v2299_v32 = vpop.f32.mrf.mxu1  ;;  %804 = vrot.lane.b32.xlu1 %v1814_v31, %s2016_s12 }
 0x23a   : > { %v678_v33 = vpop.f32.mrf.mxu1 }
 0x23b   : > { %v2302_v34 = vadd.f32 %v767_v17, %v678_v33 }
 0x23c   : > { %v2304_v35 = vpop.f32.mrf.mxu1  ;;  %920 = vrot.lane.b32.xlu1 %v799_v7, %s2016_s12  ;;  %v2329_v7 = vld [vmem:[%s2532_s6] ss:$0 sm:$0xff] }
 0x23e   : > { %v682_v36 = vpop.f32.mrf.mxu1 }
 0x23f   : > { %v2307_v38 = vadd.f32 %v767_v17, %v682_v36 }
 0x240   : > { %v2309_v39 = vpop.f32.mrf.mxu1 }
 0x242   : > { %v688_v40 = vpop.f32.mrf.mxu1 }
 0x243   : > { %v2313_v43 = vadd.f32 %v767_v17, %v688_v40 }
 0x244   : > { %v690_v44 = vpop.f32.mrf.mxu1 }
 0x245   : > { %v2316_v45 = vadd.f32 %v2311_v41, %v690_v44  ;;  %927 = vrot.lane.b32.xlu1 %v690_v44, %s2016_s12 }
 0x246   : > { %v692_v46 = vpop.f32.mrf.mxu1 }
 0x247   : > { %v2319_v47 = vadd.f32 %v767_v17, %v692_v46 }
 0x248   : > { %v694_v48 = vpop.f32.mrf.mxu1 }
 0x249   : > { %v2322_v49 = vadd.f32 %v2311_v41, %v694_v48  ;;  %802 = vrot.lane.b32.xlu0 %v694_v48, %s2016_s12 }
 0x24a   : > { %v889_v50 = vpop.f32.mrf.mxu1 }
 0x24c   : > { %v891_v51 = vpop.f32.mrf.mxu1 }
 0x24d   : > { %v909_v9 = vadd.f32 %v2329_v7, %v891_v51 }
 0x24e   : > { %v893_v52 = vpop.f32.mrf.mxu1 }
 0x250   : > { %v894_v54 = vpop.f32.mrf.mxu1 }
 0x2aa   : > { %v805_v57 = vpop.permute.xlu1 %804 }
 0x2ab   : > { %v810_v11 = vadd.f32 %v805_v57, %v775_v8 }
 0x2ae   : > { %v921_v29 = vpop.permute.xlu1 %920 }
 0x2b7   : > { %v928_v46 = vpop.permute.xlu1 %927 }
 0x2bb   : > { %v803_v59 = vpop.permute.xlu0 %802 }
 0x2bc   : > { %v806_v60 = vsel %vm481_vm4, %v803_v59, %v805_v57 }
 0x2bd   : > { %v809_v62 = vadd.f32 %v806_v60, %v774_v55 }
 0x2bf   : > { %v896_v63 = vadd.f32 %v889_v50, %v809_v62  ;;  %v750_v50 = vpop.f32.mrf.mxu0 }
 0x2c1   : > { %v1741_v1 = vmul.f32 -1.442695, %v896_v63 }
 0x2c3   : > { %1900 = vpow2.f32 %v1741_v1  ;;  %v777_v1 = vadd.f32 %v2311_v41, %v2287_v23 }
 0x2d0   : > { %v1901_v2 = vpop.eup %1900 }
 0x2d1   : > { %v900_v4 = vadd.f32 1.0, %v1901_v2 }
 0x2d3   : > { %1902 = vrcp.f32 %v900_v4 }
 0x2e0   : > { %v1903_v10 = vpop.eup %1902 }
 0x2e1   : > { %v910_v12 = vmul.f32 %v1903_v10, %v909_v9  ;;  %v913_v24 = vsub.f32 1.0, %v1903_v10  ;;  %v923_v33 = vmul.f32 %v1903_v10, %v921_v29 }
 0x2e3   : > { %v911_v17 = vadd.f32 %v910_v12, %v810_v11 }
 0x2e5   : > { %1904 = vtanh.f32 %v911_v17 }
 0x2f2   : > { %v1905_v20 = vpop.eup %1904 }
 0x2f3   : > { %915 = vrot.lane.b32.xlu0 %v1905_v20, %s2016_s12 }
 0x365   : > { %v916_v31 = vpop.permute.xlu0 %915 }
 0x366   : > { %v918_v36 = vmul.f32 %v916_v31, %v913_v24 }
 0x368   : > { %v2335_v37 = vadd.f32 %v923_v33, %v918_v36 }
 0x36a   : > { %v936_v40 = vpack.c.bf16 %v2335_v37, %v2335_v37 }
 0x36c   : > { %938 = vrot.lane.b32.xlu0 %v936_v40, %s2016_s12 }
 0x370   : > { %929 = vrot.lane.b32.xlu0 %v1813_v26, %s2016_s12 }
 0x3de   : > { %v939_v44 = vpop.permute.xlu0 %938 }
 0x3df   : > { %1743 = vmatmul.mubr.msk.bf16.vlgmr.msra.gmra.mxu0 %vm481_vm4, %v939_v44 }
 0x3e0   : > { %1108 = vmatpush1.bf16.msra.mxu0 %v2196_v53  ;;  %1131 = vmatprep.mubr.bf16.mxu0 %v2014_v0 }
 0x3e1   : > { %1109 = vmatprep.subr.bf16.mxu0 %v2201_v56 }
 0x3e2   : > { %v930_v26 = vpop.permute.xlu0 %929 }
 0x3e3   : > { %v931_v48 = vsel %vm481_vm4, %v928_v46, %v930_v26  ;;  %v935_v8 = vadd.f32 %v930_v26, %v777_v1 }
 0x3e4   : > { %1110 = vmatpush1.bf16.msra.mxu0 %v2211_v58  ;;  %v934_v51 = vadd.f32 %v931_v48, %v2283_v21 }
 0x3e5   : > { %1111 = vmatprep.subr.bf16.mxu0 %v2218_v61 }
 0x3e8   : > { %1112 = vmatpush1.bf16.msra.mxu0 %v2225_v3 }
 0x3e9   : > { %1113 = vmatprep.subr.bf16.mxu0 %v2232_v5 }
 0x3ec   : > { %1114 = vmatpush1.bf16.msra.mxu0 %v2243_v6 }
 0x3ed   : > { %1263 = vmatprep.subr.bf16.mxu0 %v2189_v42 }
 0x49f   : > { %v977_v52 = vpop.f32.mrf.mxu0 }
 0x4a0   : > { %v984_v54 = vadd.f32 %v977_v52, %v934_v51 }
 0x4a1   : > { %v979_v55 = vpop.f32.mrf.mxu0 }
 0x4a2   : > { %v1744_v57 = vmul.f32 -1.442695, %v984_v54  ;;  %v991_v2 = vadd.f32 %v2329_v7, %v979_v55 }
 0x4a3   : > { %v981_v59 = vpop.f32.mrf.mxu0 }
 0x4a4   : > { %1906 = vpow2.f32 %v1744_v57  ;;  %v779_v57 = vadd.f32 %v2311_v41, %v2293_v27 }
 0x4a5   : > { %v982_v60 = vpop.f32.mrf.mxu0 }
 0x4b1   : > { %v1907_v62 = vpop.eup %1906 }
 0x4b2   : > { %v988_v63 = vadd.f32 1.0, %v1907_v62 }
 0x4b4   : > { %1908 = vrcp.f32 %v988_v63 }
 0x4c1   : > { %v1909_v4 = vpop.eup %1908 }
 0x4c2   : > { %v992_v9 = vmul.f32 %v1909_v4, %v991_v2  ;;  %v995_v11 = vsub.f32 1.0, %v1909_v4  ;;  %v1001_v17 = vmul.f32 %v1909_v4, %v2335_v37 }
 0x4c4   : > { %v993_v10 = vadd.f32 %v992_v9, %v935_v8 }
 0x4c6   : > { %1910 = vtanh.f32 %v993_v10 }
 0x4d3   : > { %v1911_v21 = vpop.eup %1910 }
 0x4d4   : > { %997 = vrot.lane.b32.xlu1 %v1911_v21, %s2016_s12 }
 0x4d8   : > { %1005 = vrot.lane.b32.xlu1 %v2309_v39, %s2016_s12 }
 0x546   : > { %v998_v12 = vpop.permute.xlu1 %997 }
 0x547   : > { %v1000_v20 = vmul.f32 %v998_v12, %v995_v11 }
 0x549   : > { %v1002_v24 = vadd.f32 %v1001_v17, %v1000_v20 }
 0x54a   : > { %v1006_v36 = vpop.permute.xlu1 %1005 }
 0x54b   : > { %v1014_v29 = vpack.c.bf16 %v1002_v24, %v1002_v24 }
 0x54d   : > { %1016 = vrot.lane.b32.xlu0 %v1014_v29, %s2016_s12 }
 0x551   : > { %1007 = vrot.lane.b32.xlu0 %v750_v50, %s2016_s12 }
 0x5bf   : > { %v1017_v31 = vpop.permute.xlu0 %1016 }
 0x5c0   : > { %1745 = vmatmul.mubr.msk.bf16.vlgmr.msra.gmra.mxu1 %vm481_vm4, %v1017_v31 }
 0x5c1   : > { %1186 = vmatpush1.bf16.msra.mxu1 %v2196_v53  ;;  %1209 = vmatprep.mubr.bf16.mxu1 %v2014_v0 }
 0x5c2   : > { %1187 = vmatprep.subr.bf16.mxu1 %v2201_v56 }
 0x5c3   : > { %v1008_v33 = vpop.permute.xlu0 %1007 }
 0x5c4   : > { %v1009_v40 = vsel %vm481_vm4, %v1006_v36, %v1008_v33  ;;  %v1013_v62 = vadd.f32 %v1008_v33, %v779_v57 }
 0x5c5   : > { %1188 = vmatpush1.bf16.msra.mxu1 %v2211_v58  ;;  %v1012_v44 = vadd.f32 %v1009_v40, %v2291_v25 }
 0x5c6   : > { %1189 = vmatprep.subr.bf16.mxu1 %v2218_v61 }
 0x5c9   : > { %1190 = vmatpush1.bf16.msra.mxu1 %v2225_v3 }
 0x5ca   : > { %1191 = vmatprep.subr.bf16.mxu1 %v2232_v5 }
 0x5cd   : > { %1192 = vmatpush1.bf16.msra.mxu1 %v2243_v6 }
 0x5ce   : > { %1341 = vmatprep.subr.bf16.mxu1 %v2189_v42 }
 0x680   : > { %v1055_v26 = vpop.f32.mrf.mxu1 }
 0x681   : > { %v1062_v46 = vadd.f32 %v1055_v26, %v1012_v44 }
 0x682   : > { %v1057_v48 = vpop.f32.mrf.mxu1 }
 0x683   : > { %v1746_v50 = vmul.f32 -1.442695, %v1062_v46  ;;  %v1069_v59 = vadd.f32 %v2329_v7, %v1057_v48  ;;  %v781_v46 = vadd.f32 %v2311_v41, %v2299_v32 }
 0x684   : > { %v1059_v51 = vpop.f32.mrf.mxu1 }
 0x685   : > { %1912 = vpow2.f32 %v1746_v50 }
 0x686   : > { %v1060_v52 = vpop.f32.mrf.mxu1 }
 0x692   : > { %v1913_v54 = vpop.eup %1912 }
 0x693   : > { %v1066_v55 = vadd.f32 1.0, %v1913_v54 }
 0x695   : > { %1914 = vrcp.f32 %v1066_v55 }
 0x6a2   : > { %v1915_v60 = vpop.eup %1914 }
 0x6a3   : > { %v1070_v63 = vmul.f32 %v1915_v60, %v1069_v59  ;;  %v1073_v2 = vsub.f32 1.0, %v1915_v60  ;;  %v1079_v8 = vmul.f32 %v1915_v60, %v1002_v24 }
 0x6a5   : > { %v1071_v1 = vadd.f32 %v1070_v63, %v1013_v62 }
 0x6a7   : > { %1916 = vtanh.f32 %v1071_v1 }
 0x6b4   : > { %v1917_v25 = vpop.eup %1916 }
 0x6b5   : > { %1075 = vrot.lane.b32.xlu1 %v1917_v25, %s2016_s12 }
 0x6b9   : > { %1083 = vrot.lane.b32.xlu1 %v2304_v35, %s2016_s12 }
 0x727   : > { %v1076_v4 = vpop.permute.xlu1 %1075 }
 0x728   : > { %v1078_v9 = vmul.f32 %v1076_v4, %v1073_v2 }
 0x72a   : > { %v1080_v10 = vadd.f32 %v1079_v8, %v1078_v9 }
 0x72b   : > { %v1084_v12 = vpop.permute.xlu1 %1083 }
 0x72c   : > { %v1092_v21 = vpack.c.bf16 %v1080_v10, %v1080_v10 }
 0x72e   : > { %1094 = vrot.lane.b32.xlu0 %v1092_v21, %s2016_s12 }
 0x732   : > { %1085 = vrot.lane.b32.xlu0 %v2295_v28, %s2016_s12 }
 0x7a0   : > { %v1095_v11 = vpop.permute.xlu0 %1094 }
 0x7a1   : > { %1747 = vmatmul.mubr.msk.bf16.vlgmr.msra.gmra.mxu0 %vm481_vm4, %v1095_v11 }
 0x7a2   : > { %1264 = vmatpush1.bf16.msra.mxu0 %v2196_v53  ;;  %1287 = vmatprep.mubr.bf16.mxu0 %v2014_v0 }
 0x7a3   : > { %1265 = vmatprep.subr.bf16.mxu0 %v2201_v56 }
 0x7a4   : > { %v1086_v28 = vpop.permute.xlu0 %1085 }
 0x7a5   : > { %v1087_v17 = vsel %vm481_vm4, %v1084_v12, %v1086_v28  ;;  %v1091_v50 = vadd.f32 %v1086_v28, %v781_v46  ;;  %v783_v12 = vadd.f32 %v2311_v41, %v2304_v35 }
 0x7a6   : > { %1266 = vmatpush1.bf16.msra.mxu0 %v2211_v58  ;;  %v1090_v20 = vadd.f32 %v1087_v17, %v2297_v30 }
 0x7a7   : > { %1267 = vmatprep.subr.bf16.mxu0 %v2218_v61 }
 0x7aa   : > { %1268 = vmatpush1.bf16.msra.mxu0 %v2225_v3 }
 0x7ab   : > { %1269 = vmatprep.subr.bf16.mxu0 %v2232_v5 }
 0x7ae   : > { %1270 = vmatpush1.bf16.msra.mxu0 %v2243_v6 }
 0x7af   : > { %1419 = vmatprep.subr.bf16.mxu0 %v2189_v42 }
 0x861   : > { %v1133_v24 = vpop.f32.mrf.mxu0 }
 0x862   : > { %v1140_v29 = vadd.f32 %v1133_v24, %v1090_v20 }
 0x863   : > { %v1135_v31 = vpop.f32.mrf.mxu0 }
 0x864   : > { %v1748_v33 = vmul.f32 -1.442695, %v1140_v29  ;;  %v1147_v42 = vadd.f32 %v2329_v7, %v1135_v31 }
 0x865   : > { %v1137_v36 = vpop.f32.mrf.mxu0 }
 0x866   : > { %1918 = vpow2.f32 %v1748_v33 }
 0x867   : > { %v1138_v40 = vpop.f32.mrf.mxu0 }
 0x873   : > { %v1919_v44 = vpop.eup %1918 }
 0x874   : > { %v1144_v26 = vadd.f32 1.0, %v1919_v44 }
 0x876   : > { %1920 = vrcp.f32 %v1144_v26 }
 0x883   : > { %v1921_v48 = vpop.eup %1920 }
 0x884   : > { %v1148_v51 = vmul.f32 %v1921_v48, %v1147_v42  ;;  %v1151_v54 = vsub.f32 1.0, %v1921_v48  ;;  %v1157_v57 = vmul.f32 %v1921_v48, %v1080_v10 }
 0x886   : > { %v1149_v52 = vadd.f32 %v1148_v51, %v1091_v50 }
 0x888   : > { %1922 = vtanh.f32 %v1149_v52 }
 0x895   : > { %v1923_v30 = vpop.eup %1922 }
 0x896   : > { %1153 = vrot.lane.b32.xlu1 %v1923_v30, %s2016_s12 }
 0x89a   : > { %1161 = vrot.lane.b32.xlu1 %v2299_v32, %s2016_s12 }
 0x908   : > { %v1154_v55 = vpop.permute.xlu1 %1153 }
 0x909   : > { %v1156_v59 = vmul.f32 %v1154_v55, %v1151_v54 }
 0x90b   : > { %v1158_v60 = vadd.f32 %v1157_v57, %v1156_v59 }
 0x90c   : > { %v1162_v32 = vpop.permute.xlu1 %1161 }
 0x90d   : > { %v1170_v62 = vpack.c.bf16 %v1158_v60, %v1158_v60 }
 0x90f   : > { %1172 = vrot.lane.b32.xlu0 %v1170_v62, %s2016_s12 }
 0x913   : > { %1163 = vrot.lane.b32.xlu0 %v2285_v22, %s2016_s12 }
 0x981   : > { %v1173_v63 = vpop.permute.xlu0 %1172 }
 0x982   : > { %1749 = vmatmul.mubr.msk.bf16.vlgmr.msra.gmra.mxu1 %vm481_vm4, %v1173_v63 }
 0x983   : > { %1342 = vmatpush1.bf16.msra.mxu1 %v2196_v53  ;;  %1365 = vmatprep.mubr.bf16.mxu1 %v2014_v0 }
 0x984   : > { %1343 = vmatprep.subr.bf16.mxu1 %v2201_v56 }
 0x985   : > { %v1164_v22 = vpop.permute.xlu0 %1163 }
 0x986   : > { %v1165_v1 = vsel %vm481_vm4, %v1162_v32, %v1164_v22  ;;  %v1169_v24 = vadd.f32 %v1164_v22, %v783_v12 }
 0x987   : > { %1344 = vmatpush1.bf16.msra.mxu1 %v2211_v58  ;;  %v1168_v25 = vadd.f32 %v1165_v1, %v2302_v34 }
 0x988   : > { %1345 = vmatprep.subr.bf16.mxu1 %v2218_v61 }
 0x98b   : > { %1346 = vmatpush1.bf16.msra.mxu1 %v2225_v3 }
 0x98c   : > { %1347 = vmatprep.subr.bf16.mxu1 %v2232_v5 }
 0x98f   : > { %1348 = vmatpush1.bf16.msra.mxu1 %v2243_v6 }
 0x990   : > { %1815 = vmatprep.subr.bf16.mxu1 %v2015_v19 }
 0xa42   : > { %v1211_v2 = vpop.f32.mrf.mxu1 }
 0xa43   : > { %v1218_v4 = vadd.f32 %v1211_v2, %v1168_v25 }
 0xa44   : > { %v1213_v8 = vpop.f32.mrf.mxu1 }
 0xa45   : > { %v1750_v9 = vmul.f32 -1.442695, %v1218_v4  ;;  %v1225_v17 = vadd.f32 %v2329_v7, %v1213_v8 }
 0xa46   : > { %v1215_v10 = vpop.f32.mrf.mxu1 }
 0xa47   : > { %1924 = vpow2.f32 %v1750_v9 }
 0xa48   : > { %v1216_v21 = vpop.f32.mrf.mxu1 }
 0xa54   : > { %v1925_v11 = vpop.eup %1924 }
 0xa55   : > { %v1222_v28 = vadd.f32 1.0, %v1925_v11 }
 0xa57   : > { %1926 = vrcp.f32 %v1222_v28 }
 0xa64   : > { %v1927_v20 = vpop.eup %1926 }
 0xa65   : > { %v1226_v29 = vmul.f32 %v1927_v20, %v1225_v17  ;;  %v1229_v33 = vsub.f32 1.0, %v1927_v20  ;;  %v1235_v40 = vmul.f32 %v1927_v20, %v1158_v60 }
 0xa67   : > { %v1227_v31 = vadd.f32 %v1226_v29, %v1169_v24 }
 0xa69   : > { %1928 = vtanh.f32 %v1227_v31 }
 0xa76   : > { %v1929_v34 = vpop.eup %1928 }
 0xa77   : > { %1231 = vrot.lane.b32.xlu1 %v1929_v34, %s2016_s12 }
 0xa7b   : > { %1239 = vrot.lane.b32.xlu1 %v2293_v27, %s2016_s12 }
 0xae9   : > { %v1232_v36 = vpop.permute.xlu1 %1231 }
 0xaea   : > { %v1234_v44 = vmul.f32 %v1232_v36, %v1229_v33 }
 0xaec   : > { %v1236_v26 = vadd.f32 %v1235_v40, %v1234_v44 }
 0xaed   : > { %v1240_v27 = vpop.permute.xlu1 %1239 }
 0xaee   : > { %v1248_v46 = vpack.c.bf16 %v1236_v26, %v1236_v26 }
 0xaf0   : > { %1250 = vrot.lane.b32.xlu0 %v1248_v46, %s2016_s12 }
 0xaf4   : > { %1241 = vrot.lane.b32.xlu0 %v2277_v15, %s2016_s12 }
 0xb62   : > { %v1251_v35 = vpop.permute.xlu0 %1250 }
 0xb63   : > { %1751 = vmatmul.mubr.msk.bf16.vlgmr.msra.gmra.mxu0 %vm481_vm4, %v1251_v35 }
 0xb64   : > { %1420 = vmatpush1.bf16.msra.mxu0 %v2196_v53  ;;  %1443 = vmatprep.mubr.bf16.mxu0 %v2014_v0 }
 0xb65   : > { %1421 = vmatprep.subr.bf16.mxu0 %v2201_v56 }
 0xb66   : > { %v1242_v15 = vpop.permute.xlu0 %1241 }
 0xb67   : > { %v1243_v42 = vsel %vm481_vm4, %v1240_v27, %v1242_v15 }
 0xb68   : > { %1422 = vmatpush1.bf16.msra.mxu0 %v2211_v58  ;;  %v1246_v53 = vadd.f32 %v1243_v42, %v2307_v38 }
 0xb69   : > { %1423 = vmatprep.subr.bf16.mxu0 %v2218_v61 }
 0xb6c   : > { %1424 = vmatpush1.bf16.msra.mxu0 %v2225_v3  ;;  %v785_v3 = vadd.f32 %v2311_v41, %v2309_v39 }
 0xb6d   : > { %1425 = vmatprep.subr.bf16.mxu0 %v2232_v5 }
 0xb6e   : > { %v1247_v30 = vadd.f32 %v1242_v15, %v785_v3 }
 0xb70   : > { %1426 = vmatpush1.bf16.msra.mxu0 %v2243_v6 }
 0xc23   : > { %v1289_v48 = vpop.f32.mrf.mxu0 }
 0xc24   : > { %v1296_v0 = vadd.f32 %v1289_v48, %v1246_v53 }
 0xc25   : > { %v1291_v50 = vpop.f32.mrf.mxu0 }
 0xc26   : > { %v1752_v56 = vmul.f32 -1.442695, %v1296_v0  ;;  %v1303_v5 = vadd.f32 %v2329_v7, %v1291_v50 }
 0xc27   : > { %v1293_v51 = vpop.f32.mrf.mxu0 }
 0xc28   : > { %1930 = vpow2.f32 %v1752_v56 }
 0xc29   : > { %v1294_v58 = vpop.f32.mrf.mxu0 }
 0xc35   : > { %v1931_v61 = vpop.eup %1930 }
 0xc36   : > { %v1300_v52 = vadd.f32 1.0, %v1931_v61  ;;  %v1897_v61 = vld [vmem:[%s2533_s7 + $0x10] sm:$0xff]  }
 0xc38   : > { %1932 = vrcp.f32 %v1300_v52  ;;  %v1899_v52 = vld [vmem:[%s2533_s7] sm:$0xff]  }
 0xc45   : > { %v1933_v6 = vpop.eup %1932 }
 0xc46   : > { %v1304_v54 = vmul.f32 %v1933_v6, %v1303_v5  ;;  %v1307_v57 = vsub.f32 1.0, %v1933_v6  ;;  %v1313_v60 = vmul.f32 %v1933_v6, %v1236_v26 }
 0xc48   : > { %v1305_v55 = vadd.f32 %v1304_v54, %v1247_v30 }
 0xc4a   : > { %1934 = vtanh.f32 %v1305_v55 }
 0xc57   : > { %v1935_v38 = vpop.eup %1934 }
 0xc58   : > { %1309 = vrot.lane.b32.xlu1 %v1935_v38, %s2016_s12 }
 0xc5c   : > { %1317 = vrot.lane.b32.xlu1 %v2287_v23, %s2016_s12 }
 0xcca   : > { %v1310_v59 = vpop.permute.xlu1 %1309 }
 0xccb   : > { %v1312_v62 = vmul.f32 %v1310_v59, %v1307_v57  ;;  %v1757_v57 = vld [vmem:[%s2534_s8] ss:$0 sm:$0xff] }
 0xccd   : > { %v1314_v63 = vadd.f32 %v1313_v60, %v1312_v62 }
 0xcce   : > { %v1318_v32 = vpop.permute.xlu1 %1317 }
 0xccf   : > { %v1326_v22 = vpack.c.bf16 %v1314_v63, %v1314_v63 }
 0xcd1   : > { %1328 = vrot.lane.b32.xlu0 %v1326_v22, %s2016_s12 }
 0xcd5   : > { %1319 = vrot.lane.b32.xlu0 %v2289_v13, %s2016_s12 }
 0xd43   : > { %v1329_v39 = vpop.permute.xlu0 %1328 }
 0xd44   : > { %1753 = vmatmul.mubr.msk.bf16.vlgmr.msra.gmra.mxu1 %vm481_vm4, %v1329_v39 }
 0xd45   : > { %1823 = vmatprep.mubr.msk.bf16.mxu1 %vm2017_vm10, %v2015_v19 }
 0xd47   : > { %v1320_v41 = vpop.permute.xlu0 %1319 }
 0xd48   : > { %v1321_v1 = vsel %vm481_vm4, %v1318_v32, %v1320_v41  ;;  %v1325_v12 = vadd.f32 %v1320_v41, %v2316_v45 }
 0xd49   : > { %v1324_v23 = vadd.f32 %v1321_v1, %v2313_v43 }
 0xe04   : > { %v1367_v25 = vpop.f32.mrf.mxu1 }
 0xe05   : > { %v1374_v2 = vadd.f32 %v1367_v25, %v1324_v23 }
 0xe06   : > { %v1369_v4 = vpop.f32.mrf.mxu1 }
 0xe07   : > { %v1754_v8 = vmul.f32 -1.442695, %v1374_v2  ;;  %v1381_v13 = vadd.f32 %v2329_v7, %v1369_v4 }
 0xe08   : > { %v1371_v9 = vpop.f32.mrf.mxu1 }
 0xe09   : > { %1936 = vpow2.f32 %v1754_v8 }
 0xe0a   : > { %v1372_v10 = vpop.f32.mrf.mxu1 }
 0xe16   : > { %v1937_v21 = vpop.eup %1936 }
 0xe17   : > { %v1378_v11 = vadd.f32 1.0, %v1937_v21 }
 0xe19   : > { %1938 = vrcp.f32 %v1378_v11 }
 0xe26   : > { %v1939_v28 = vpop.eup %1938 }
 0xe27   : > { %v1382_v17 = vmul.f32 %v1939_v28, %v1381_v13  ;;  %v1385_v43 = vsub.f32 1.0, %v1939_v28  ;;  %v1391_v31 = vmul.f32 %v1939_v28, %v1314_v63 }
 0xe29   : > { %v1383_v20 = vadd.f32 %v1382_v17, %v1325_v12 }
 0xe2b   : > { %1940 = vtanh.f32 %v1383_v20 }
 0xe38   : > { %v1941_v24 = vpop.eup %1940 }
 0xe39   : > { %1387 = vrot.lane.b32.xlu1 %v1941_v24, %s2016_s12 }
 0xe3d   : > { %1395 = vrot.lane.b32.xlu1 %v2279_v16, %s2016_s12 }
 0xeab   : > { %v1388_v29 = vpop.permute.xlu1 %1387 }
 0xeac   : > { %v1390_v34 = vmul.f32 %v1388_v29, %v1385_v43 }
 0xeae   : > { %v1392_v33 = vadd.f32 %v1391_v31, %v1390_v34 }
 0xeaf   : > { %v1396_v44 = vpop.permute.xlu1 %1395 }
 0xeb0   : > { %v1404_v36 = vpack.c.bf16 %v1392_v33, %v1392_v33 }
 0xeb2   : > { %1406 = vrot.lane.b32.xlu0 %v1404_v36, %s2016_s12 }
 0xeb6   : > { %1397 = vrot.lane.b32.xlu0 %v2281_v18, %s2016_s12 }
 0xf24   : > { %v1407_v45 = vpop.permute.xlu0 %1406 }
 0xf25   : > { %1755 = vmatmul.mubr.msk.bf16.vlgmr.msra.gmra.mxu0 %vm481_vm4, %v1407_v45 }
 0xf28   : > { %v1398_v40 = vpop.permute.xlu0 %1397 }
 0xf29   : > { %v1399_v26 = vsel %vm481_vm4, %v1396_v44, %v1398_v40  ;;  %v1403_v56 = vadd.f32 %v1398_v40, %v2322_v49 }
 0xf2a   : > { %v1402_v16 = vadd.f32 %v1399_v26, %v2319_v47  ;;  %v1896_v47 = vld [vmem:[%s2533_s7 + $0x18] sm:$0xff]  }
 0xf2b   : > { %1816 = vmatpush3.bf16.msra.mxu1 %v1896_v47 }
 0xf2c   : > { %1817 = vmatprep.subr.bf16.mxu1 %v2015_v19 }
 0xf2f   : > { %1818 = vmatpush3.bf16.msra.mxu1 %v1897_v61 }
 0xf30   : > { %1819 = vmatprep.subr.bf16.mxu1 %v2015_v19 }
 0xfe5   : > { %v1445_v46 = vpop.f32.mrf.mxu0 }
 0xfe6   : > { %v1452_v35 = vadd.f32 %v1445_v46, %v1402_v16 }
 0xfe7   : > { %v1447_v15 = vpop.f32.mrf.mxu0 }
 0xfe8   : > { %v1756_v27 = vmul.f32 -1.442695, %v1452_v35  ;;  %v1459_v18 = vadd.f32 %v2329_v7, %v1447_v15  ;;  %v1898_v7 = vld [vmem:[%s2533_s7 + $0x8] sm:$0xff]  }
 0xfe9   : > { %v1449_v42 = vpop.f32.mrf.mxu0  ;;  %1820 = vmatpush3.bf16.msra.mxu1 %v1898_v7 }
 0xfea   : > { %1942 = vpow2.f32 %v1756_v27  ;;  %1821 = vmatprep.subr.bf16.mxu1 %v2015_v19 }
 0xfeb   : > { %v1450_v53 = vpop.f32.mrf.mxu0 }
 0xfed   : > { %1822 = vmatpush3.bf16.msra.mxu1 %v1899_v52 }
 0xff7   : > { %v1943_v48 = vpop.eup %1942 }
 0xff8   : > { %v1456_v0 = vadd.f32 1.0, %v1943_v48 }
 0xffa   : > { %1944 = vrcp.f32 %v1456_v0 }
0x1007   : > { %v1945_v50 = vpop.eup %1944 }
0x1008   : > { %v1460_v51 = vmul.f32 %v1945_v50, %v1459_v18  ;;  %v1463_v3 = vsub.f32 1.0, %v1945_v50  ;;  %v1469_v6 = vmul.f32 %v1945_v50, %v1392_v33 }
0x100a   : > { %v1461_v58 = vadd.f32 %v1460_v51, %v1403_v56 }
0x100c   : > { %1946 = vtanh.f32 %v1461_v58 }
0x1019   : > { %v1947_v49 = vpop.eup %1946 }
0x101a   : > { %1465 = vrot.lane.b32.xlu1 %v1947_v49, %s2016_s12 }
0x101e   : > { %1477 = vrot.lane.b32.xlu1 %v2335_v37, %s2016_s12 }
0x108c   : > { %v1466_v5 = vpop.permute.xlu1 %1465 }
0x108d   : > { %v1468_v30 = vmul.f32 %v1466_v5, %v1463_v3 }
0x108f   : > { %v1470_v54 = vadd.f32 %v1469_v6, %v1468_v30 }
0x1090   : > { %v1478_v37 = vpop.permute.xlu1 %1477 }
0x1091   : > { %1473 = vrot.lane.b32.xlu0 %v1470_v54, %s2016_s12  ;;  %s1764_s12 = sshll.u32 %s2095_s17, 7  ;;  %s1958_s17 = scalar_lea.vmem %s1957_s0, 256 }
0x1092   : > { %s1593_s26 = scalar_lea.hbm %s2535_s9, %s1764_s12  ;;  %p1960_p1 = scmp.lt.s32.totalorder %s1958_s17, %s1952_s29 }
0x1094   : > { %p1961_p2 = por %p1960_p1, %p1959_p0 }
0x1096   : > { %p1962_p3 = pnand %p1961_p2, %p1955_p13 }
0x1103   : > { %v1474_v55 = vpop.permute.xlu0 %1473 }
0x1104   : > { %v1480_v38 = vsel %vm1471_vm11, %v1474_v55, %v1478_v37  ;;  %1576 = vst.msk [vmem:[%s385_s28] sm:$0xff] %vm481_vm4, %v1474_v55  ;;  %s1578_s28 = scalar_lea.sflag [#allocation3], %s364_s27 }
0x1105   : > { %v1481_v19 = vpack.c.bf16 %v1480_v38, %v1480_v38 }
0x1107   : > { %1824 = vmatmul.mubr.msk.bf16.vlgmr.msra.gmra.mxu1 %vm481_vm4, %v1481_v19 }
0x11c7   : > { %v1558_v59 = vpop.f32.mrf.mxu1 }
0x11c8   : > { %v1559_v60 = vadd.f32 %v1757_v57, %v1558_v59 }
0x11c9   : > { %v1825_v62 = vpop.f32.mrf.mxu1 }
0x11ca   : > { %1564 = vmax.xlane.f32.xlu0 %v1559_v60 }
0x11cb   : > { %v1561_v63 = vpop.f32.mrf.mxu1 }
0x11cd   : > { %v1826_v14 = vpop.f32.mrf.mxu1 }
0x1253   : > { %v1565_v22 = vpop.xlane.xlu0 %1564 }
0x1254   : > { %v1566_v39 = vsub.f32 %v1559_v60, %v1565_v22 }
0x1256   : > { %v1567_v41 = vmul.f32 1.442695, %v1566_v39 }
0x1258   : > { %1948 = vpow2.f32 %v1567_v41 }
0x1265   : > { %v1949_v32 = vpop.eup %1948 }
0x1266   : > { %1569 = vadd.xlane.f32.xlu1 %v1949_v32 }
0x12ef   : > { %v1570_v1 = vpop.xlane.xlu1 %1569 }
0x12f0   : > { %1950 = vlog2.f32 %v1570_v1 }
0x12fd   : > { %v1951_v23 = vpop.eup %1950 }
0x12fe   : > { %v1572_v25 = vmul.f32 0.6931472, %v1951_v23 }
0x1300   : > { %v1573_v2 = vadd.f32 %v1572_v25, %v1565_v22 }
0x1302   : > { %v1574_v4 = vsub.f32 %v1559_v60, %v1573_v2 }
0x1304   : > { %1575 = vst [vmem:[%s366_s11] sm:$0xff] %v1574_v4 }
0x1305   : > { %1965 = shalt.err (!%p1962_p3)
}
0x1306   : > { %s1966_s25 = scalar_lea.hbm %s1593_s26, 128  ;;  %s1970_s11 = scalar_lea.hbm %s2535_s9, 256 }
0x1307   : > { %p1967_p4 = scmp.ne.s32.totalorder %s1593_s26, %s1966_s25  ;;  %p1971_p9 = scmp.lt.s32.totalorder %s1593_s26, %s2535_s9 }
0x1308   : > { %p1972_p10 = scmp.lt.s32.totalorder %s1970_s11, %s1966_s25 }
0x1309   : > { %p1968_p7 = pnand %p1967_p4, %p2112_p5 }
0x130a   : > { %p1973_p11 = por %p1972_p10, %p1971_p9 }
0x130b   : > { %p1969_p8 = pneg %p1968_p7 }
0x130d   : > { %p1974_p12 = pnand %p1973_p11, %p1969_p8 }
0x130f   : > { %1977 = shalt.err (!%p1974_p12)
}
0x1310   : > { %1827 = dma.vmem_to_hbm [thread:$0]  (%p2112_p5), %s1596_s18, 128, %s1593_s26, %s1578_s28  }
0x1311 PF: > { %p1833_p13 = scmp.ge.s32.totalorder %s2012_s16, 2  ;;  %s1610_s0 = sand.u32 1, %s2000_s13  }
0x1312   : > { %s1611_s29 = scalar_lea.sflag [#allocation3], %s1610_s0 }
0x1313   : > { %p1830_p0 = pnand %p1833_p13, %p2116_p6 }
0x1315   : > { %p1831_p1 = pneg %p1830_p0 }
0x1317   : > { %1995 = dma.done.wait (%p1831_p1), %s1611_s29, 128  }
0x1318   : > { %1997 = vsyncadd (%p1831_p1), %s1611_s29, 4294967168  ;;  %p21_p2 = scmp.ge.s32.totalorder %s2099_s19, 4   ;;  %s2541_s13 = smov %s2004_s14 }
0x1319   : > { %s2542_s14 = smov %s2008_s15  ;;  %s2543_s15 = smov %s2110_s22 }
0x131a   : > { %s2544_s16 = smov %s2099_s19  ;;  %23 = sbr.rel (!%p21_p2) target bundleno = 5 (0x5), region = 106 }
0x131f   :  { %1623 = vsyncpa [#allocation3], 1 }
0x1320   :  { %1625 = vsyncpa [#allocation3 + $0x1], 1 }

</bundles_post_ra>
